<compile_context>
chip_gen: v5e
topology: v5e:2x2
jax: 0.10.0
libtpu: 0.0.40
codegen_flags: <defaults>
</compile_context>

<pallas_src>
import functools

import jax
import jax.numpy as jnp
from jax.experimental import pallas as pl
from jax.experimental.pallas import tpu as pltpu


def _round_up(v, m):
    return ((v + m - 1) // m) * m


def _lstm_kernel(x_ref, wih_ref, whh_ref, b_ref, h_ref, c_ref, gates_ref,
                 *, hidden_pad, batch_pad, chunk, seq_len):
    """One time-chunk of the LSTM recurrence.

    x_ref:     (chunk*Bp, D)    bf16, time-major rows (row = t*Bp + b)
    wih_ref:   (D, 4*Hp)        bf16, input->gate weights, gate blocks lane-aligned
    whh_ref:   (Hp, 4*Hp)       f32,  hidden->gate weights, gate blocks lane-aligned
    b_ref:     (1, 4*Hp)        f32,  b_ih + b_hh (padded)
    h_ref:     (Bp, Hp)         f32 output ref, resident across grid (running h)
    c_ref:     (Bp, Hp)         f32 output ref, resident across grid (running c)
    gates_ref: (chunk*Bp, 4*Hp) f32 scratch for the hoisted input projection
    """
    Hp = hidden_pad
    Bp = batch_pad
    pid = pl.program_id(0)

    @pl.when(pid == 0)
    def _init():
        # PyTorch default h_0 = c_0 = 0 when hx is not supplied.
        h_ref[...] = jnp.zeros_like(h_ref)
        c_ref[...] = jnp.zeros_like(c_ref)

    # Hoisted input projection for the whole chunk: a single (chunk*Bp, D)@(D, 4Hp)
    # bf16 MXU matmul with f32 accumulation; bias folded in once (not per step).
    gates_ref[...] = (
        jnp.dot(x_ref[...], wih_ref[...], preferred_element_type=jnp.float32)
        + b_ref[...]
    )

    whh = whh_ref[...]

    def step(t, carry):
        h_prev, c_prev = carry
        row = pl.multiple_of(t * Bp, Bp)
        # Per-step work: one small recurrent matmul + elementwise gates.
        g = gates_ref[pl.ds(row, Bp), :] + jnp.dot(
            h_prev, whh, preferred_element_type=jnp.float32)
        # Gate order i, f, g, o; each slice starts on a 128-lane boundary (Hp%128==0).
        i_g = jax.nn.sigmoid(g[:, 0 * Hp:1 * Hp])
        f_g = jax.nn.sigmoid(g[:, 1 * Hp:2 * Hp])
        g_g = jnp.tanh(g[:, 2 * Hp:3 * Hp])
        o_g = jax.nn.sigmoid(g[:, 3 * Hp:4 * Hp])
        c_new = f_g * c_prev + i_g * g_g
        h_new = o_g * jnp.tanh(c_new)
        if seq_len % chunk != 0:
            # Padded timesteps in the last chunk must not advance the state.
            valid = (pid * chunk + t) < seq_len
            h_new = jnp.where(valid, h_new, h_prev)
            c_new = jnp.where(valid, c_new, c_prev)
        return h_new, c_new

    # State carried in vregs across the whole chunk; refs touched once per chunk.
    h_f, c_f = jax.lax.fori_loop(
        0, chunk, step, (h_ref[...], c_ref[...]),
        unroll=(chunk if chunk <= 8 else 4))
    h_ref[...] = h_f
    c_ref[...] = c_f


def encoder_forward(x, w_ih, w_hh, b_ih, b_hh):
    """Mirrors Encoder.forward: returns (h_n, c_n), each of shape (1, B, H).

    x:    (B, T, D)  float32
    w_ih: (4H, D), w_hh: (4H, H), b_ih/b_hh: (4H,)  -- PyTorch parameter shapes.
    """
    B, T, D = x.shape
    H = w_hh.shape[1]

    B_pad = max(8, _round_up(B, 8))      # fill f32 sublanes / some MXU rows
    H_pad = _round_up(H, 128)            # lane-aligned gate blocks

    # Time-chunk size: cap at 128 steps and keep the gate scratch under ~4 MiB.
    gate_row_bytes = B_pad * 4 * H_pad * 4
    chunk = max(1, min(T, 128, (4 * 2 ** 20) // gate_row_bytes))
    num_chunks = -(-T // chunk)
    T_pad = num_chunks * chunk

    # ---- layout prep (XLA wrapper): pad, time-major flatten, bf16 cast ----
    x_tm = jnp.transpose(x, (1, 0, 2)).astype(jnp.float32)            # (T, B, D)
    x_tm = jnp.pad(x_tm, ((0, T_pad - T), (0, B_pad - B), (0, 0)))
    x_flat = x_tm.reshape(T_pad * B_pad, D).astype(jnp.bfloat16)

    # PyTorch packs gates [i, f, g, o] along the 4H axis; re-pack so each gate
    # block starts on a 128-lane boundary (H padded to H_pad with zeros).
    w_ih4 = jnp.pad(w_ih.astype(jnp.float32).reshape(4, H, D),
                    ((0, 0), (0, H_pad - H), (0, 0)))
    wih = jnp.transpose(w_ih4, (2, 0, 1)).reshape(D, 4 * H_pad).astype(jnp.bfloat16)

    w_hh4 = jnp.pad(w_hh.astype(jnp.float32).reshape(4, H, H),
                    ((0, 0), (0, H_pad - H), (0, H_pad - H)))
    whh = jnp.transpose(w_hh4, (2, 0, 1)).reshape(H_pad, 4 * H_pad)

    b4 = jnp.pad((b_ih + b_hh).astype(jnp.float32).reshape(4, H),
                 ((0, 0), (0, H_pad - H)))
    bias = b4.reshape(1, 4 * H_pad)

    # Explicit VMEM budget so the kernel fits v5e's 16 MiB scoped default and
    # v7x's 64 MiB physical VMEM without retuning.
    vmem_est = (
        2 * chunk * B_pad * D * 2            # x chunk (bf16, double buffered)
        + 2 * D * 4 * H_pad * 2              # W_ih (bf16)
        + 2 * H_pad * 4 * H_pad * 4          # W_hh (f32)
        + 2 * 4 * H_pad * 4                  # bias
        + 2 * 2 * B_pad * H_pad * 4          # h, c outputs
        + chunk * B_pad * 4 * H_pad * 4      # gates scratch
    )
    vmem_limit = int(min(max(2 * vmem_est, 16 * 2 ** 20), 48 * 2 ** 20))

    kernel = functools.partial(
        _lstm_kernel, hidden_pad=H_pad, batch_pad=B_pad, chunk=chunk, seq_len=T)

    h_full, c_full = pl.pallas_call(
        kernel,
        out_shape=(
            jax.ShapeDtypeStruct((B_pad, H_pad), jnp.float32),
            jax.ShapeDtypeStruct((B_pad, H_pad), jnp.float32),
        ),
        grid_spec=pltpu.PrefetchScalarGridSpec(
            num_scalar_prefetch=0,
            grid=(num_chunks,),
            in_specs=[
                pl.BlockSpec((chunk * B_pad, D), lambda i: (i, 0)),
                pl.BlockSpec((D, 4 * H_pad), lambda i: (0, 0)),
                pl.BlockSpec((H_pad, 4 * H_pad), lambda i: (0, 0)),
                pl.BlockSpec((1, 4 * H_pad), lambda i: (0, 0)),
            ],
            out_specs=[
                pl.BlockSpec((B_pad, H_pad), lambda i: (0, 0)),
                pl.BlockSpec((B_pad, H_pad), lambda i: (0, 0)),
            ],
            scratch_shapes=[
                pltpu.VMEM((chunk * B_pad, 4 * H_pad), jnp.float32),
            ],
        ),
        compiler_params=pltpu.CompilerParams(
            dimension_semantics=("arbitrary",),   # serial recurrence over time chunks
            vmem_limit_bytes=vmem_limit,
        ),
    )(x_flat, wih, whh, bias)

    # TODO(synk): for batched multi-sequence inference on v7x, shard a leading batch
    # grid axis across the two TensorCores ("parallel"); a single recurrence is serial.

    # nn.LSTM returns hiddens with a leading num_layers*num_directions = 1 axis.
    h_n = h_full[:B, :H][None, :, :]
    c_n = c_full[:B, :H][None, :, :]
    return h_n, c_n


def _reference_lstm(x, w_ih, w_hh, b_ih, b_hh):
    """Pure-JAX reference implementation of the same LSTM (for validation)."""
    B, T, D = x.shape
    H = w_hh.shape[1]
    h = jnp.zeros((B, H), jnp.float32)
    c = jnp.zeros((B, H), jnp.float32)
    bias = b_ih + b_hh
    for t in range(T):
        gates = x[:, t, :] @ w_ih.T + h @ w_hh.T + bias
        i_g = jax.nn.sigmoid(gates[:, 0 * H:1 * H])
        f_g = jax.nn.sigmoid(gates[:, 1 * H:2 * H])
        g_g = jnp.tanh(gates[:, 2 * H:3 * H])
        o_g = jax.nn.sigmoid(gates[:, 3 * H:4 * H])
        c = f_g * c + i_g * g_g
        h = o_g * jnp.tanh(c)
    return h[None], c[None]


if __name__ == "__main__":
    # Small shapes implied by the forward: x is (batch, seq, input_size).
    B, T, D, H = 2, 8, 4, 32

    key = jax.random.PRNGKey(0)
    kx, k1, k2, k3, k4 = jax.random.split(key, 5)

    x = jax.random.normal(kx, (B, T, D), jnp.float32)

    # Deterministic synthetic params with PyTorch LSTM shapes and init scale.
    bound = 1.0 / (H ** 0.5)
    w_ih = jax.random.uniform(k1, (4 * H, D), jnp.float32, -bound, bound)
    w_hh = jax.random.uniform(k2, (4 * H, H), jnp.float32, -bound, bound)
    b_ih = jax.random.uniform(k3, (4 * H,), jnp.float32, -bound, bound)
    b_hh = jax.random.uniform(k4, (4 * H,), jnp.float32, -bound, bound)

    h_n, c_n = encoder_forward(x, w_ih, w_hh, b_ih, b_hh)
    jax.block_until_ready((h_n, c_n))

    h_ref, c_ref = _reference_lstm(x, w_ih, w_hh, b_ih, b_hh)
    assert h_n.shape == (1, B, H) and c_n.shape == (1, B, H)
    assert jnp.allclose(h_n, h_ref, atol=1e-2, rtol=1e-2)
    assert jnp.allclose(c_n, c_ref, atol=1e-2, rtol=1e-2)

    print("KERNEL_OK")
</pallas_src>

<mosaic_0001>
module attributes {stable_mosaic.version = 11 : i64} {
  func.func @_lstm_kernel(%arg0: i32, %arg1: memref<64x4xbf16, #tpu.memory_space<vmem>>, %arg2: memref<4x512xbf16, #tpu.memory_space<vmem>>, %arg3: memref<128x512xf32, #tpu.memory_space<vmem>>, %arg4: memref<1x512xf32, #tpu.memory_space<vmem>>, %arg5: memref<8x128xf32, #tpu.memory_space<vmem>>, %arg6: memref<8x128xf32, #tpu.memory_space<vmem>>, %arg7: memref<64x512xf32, #tpu.memory_space<vmem>>) attributes {dimension_semantics = [#tpu.dimension_semantics<arbitrary>], iteration_bounds = array<i64: 1>, scalar_prefetch = 0 : i64, scratch_operands = 1 : i64, tpu.core_type = #tpu.core_type<tc>, window_params = [{transform_indices = @transform_0, window_bounds = array<i64: 64, 4>}, {pipeline_mode = #tpu.pipeline_mode<synchronous>, transform_indices = @transform_1, window_bounds = array<i64: 4, 512>}, {pipeline_mode = #tpu.pipeline_mode<synchronous>, transform_indices = @transform_2, window_bounds = array<i64: 128, 512>}, {pipeline_mode = #tpu.pipeline_mode<synchronous>, transform_indices = @transform_3, window_bounds = array<i64: 1, 512>}, {pipeline_mode = #tpu.pipeline_mode<synchronous>, transform_indices = @transform_4, window_bounds = array<i64: 8, 128>}, {pipeline_mode = #tpu.pipeline_mode<synchronous>, transform_indices = @transform_5, window_bounds = array<i64: 8, 128>}]} {
    %c0_i32 = arith.constant 0 : i32
    %0 = arith.cmpi eq, %arg0, %c0_i32 : i32
    %1 = arith.extui %0 : i1 to i32
    %c0_i32_0 = arith.constant 0 : i32
    %2 = arith.cmpi ne, %1, %c0_i32_0 : i32
    scf.if %2 {
      %cst_67 = arith.constant 0.000000e+00 : f32
      %263 = vector.broadcast %cst_67 : f32 to vector<8x128xf32>
      %c0_68 = arith.constant 0 : index
      %c0_69 = arith.constant 0 : index
      %264 = vector.load %arg5[%c0_68, %c0_69] : memref<8x128xf32, #tpu.memory_space<vmem>>, vector<8x128xf32>
      tpu.vector_store %arg5[%c0_68, %c0_69], %263 {strides = array<i32>} : memref<8x128xf32, #tpu.memory_space<vmem>>, vector<8x128xf32>,
      %cst_70 = arith.constant 0.000000e+00 : f32
      %265 = vector.broadcast %cst_70 : f32 to vector<8x128xf32>
      %c0_71 = arith.constant 0 : index
      %c0_72 = arith.constant 0 : index
      %266 = vector.load %arg6[%c0_71, %c0_72] : memref<8x128xf32, #tpu.memory_space<vmem>>, vector<8x128xf32>
      tpu.vector_store %arg6[%c0_71, %c0_72], %265 {strides = array<i32>} : memref<8x128xf32, #tpu.memory_space<vmem>>, vector<8x128xf32>,
    } else {
    }
    %c0 = arith.constant 0 : index
    %c0_1 = arith.constant 0 : index
    %3 = vector.load %arg1[%c0, %c0_1] : memref<64x4xbf16, #tpu.memory_space<vmem>>, vector<64x4xbf16>
    %c0_2 = arith.constant 0 : index
    %c0_3 = arith.constant 0 : index
    %4 = vector.load %arg2[%c0_2, %c0_3] : memref<4x512xbf16, #tpu.memory_space<vmem>>, vector<4x512xbf16>
    %cst = arith.constant dense<0.000000e+00> : vector<64x512xf32>
    %5 = tpu.matmul %3, %4, %cst {dimension_numbers = #tpu.dot_dimension_numbers<[1], [0], [0], [1], [0, 0, 1, 1], [], []>} : vector<64x4xbf16>, vector<4x512xbf16>, vector<64x512xf32> -> vector<64x512xf32>
    %c0_4 = arith.constant 0 : index
    %c0_5 = arith.constant 0 : index
    %6 = vector.load %arg4[%c0_4, %c0_5] : memref<1x512xf32, #tpu.memory_space<vmem>>, vector<1x512xf32>
    %7 = vector.broadcast %6 : vector<1x512xf32> to vector<64x512xf32>
    %8 = arith.addf %5, %7 : vector<64x512xf32>
    %c0_6 = arith.constant 0 : index
    %c0_7 = arith.constant 0 : index
    %9 = vector.load %arg7[%c0_6, %c0_7] : memref<64x512xf32, #tpu.memory_space<vmem>>, vector<64x512xf32>
    tpu.vector_store %arg7[%c0_6, %c0_7], %8 {strides = array<i32>} : memref<64x512xf32, #tpu.memory_space<vmem>>, vector<64x512xf32>,
    %c0_8 = arith.constant 0 : index
    %c0_9 = arith.constant 0 : index
    %10 = vector.load %arg3[%c0_8, %c0_9] : memref<128x512xf32, #tpu.memory_space<vmem>>, vector<128x512xf32>
    %c0_10 = arith.constant 0 : index
    %c0_11 = arith.constant 0 : index
    %11 = vector.load %arg5[%c0_10, %c0_11] : memref<8x128xf32, #tpu.memory_space<vmem>>, vector<8x128xf32>
    %c0_12 = arith.constant 0 : index
    %c0_13 = arith.constant 0 : index
    %12 = vector.load %arg6[%c0_12, %c0_13] : memref<8x128xf32, #tpu.memory_space<vmem>>, vector<8x128xf32>
    %c0_i32_14 = arith.constant 0 : i32
    %c8_i32 = arith.constant 8 : i32
    %13 = arith.muli %c0_i32_14, %c8_i32 : i32
    %14 = tpu.assume_multiple %13, 8 : i32
    %15 = arith.index_cast %14 : i32 to index
    %c0_15 = arith.constant 0 : index
    %16 = vector.load %arg7[%15, %c0_15] : memref<64x512xf32, #tpu.memory_space<vmem>>, vector<8x512xf32>
    %cst_16 = arith.constant dense<0.000000e+00> : vector<8x512xf32>
    %17 = tpu.matmul %11, %10, %cst_16 {dimension_numbers = #tpu.dot_dimension_numbers<[1], [0], [0], [1], [0, 0, 1, 1], [], []>} : vector<8x128xf32>, vector<128x512xf32>, vector<8x512xf32> -> vector<8x512xf32>
    %18 = arith.addf %16, %17 : vector<8x512xf32>
    %19 = vector.extract_strided_slice %18 {offsets = [0, 0], sizes = [8, 128], strides = [1, 1]} : vector<8x512xf32> to vector<8x128xf32>
    %20 = arith.negf %19 : vector<8x128xf32>
    %21 = math.exp %20 : vector<8x128xf32>
    %cst_17 = arith.constant 1.000000e+00 : f32
    %22 = vector.broadcast %cst_17 : f32 to vector<8x128xf32>
    %23 = arith.addf %22, %21 : vector<8x128xf32>
    %24 = arith.divf %22, %23 : vector<8x128xf32>
    %25 = vector.extract_strided_slice %18 {offsets = [0, 128], sizes = [8, 128], strides = [1, 1]} : vector<8x512xf32> to vector<8x128xf32>
    %26 = arith.negf %25 : vector<8x128xf32>
    %27 = math.exp %26 : vector<8x128xf32>
    %cst_18 = arith.constant 1.000000e+00 : f32
    %28 = vector.broadcast %cst_18 : f32 to vector<8x128xf32>
    %29 = arith.addf %28, %27 : vector<8x128xf32>
    %30 = arith.divf %28, %29 : vector<8x128xf32>
    %31 = vector.extract_strided_slice %18 {offsets = [0, 256], sizes = [8, 128], strides = [1, 1]} : vector<8x512xf32> to vector<8x128xf32>
    %32 = math.tanh %31 : vector<8x128xf32>
    %33 = vector.extract_strided_slice %18 {offsets = [0, 384], sizes = [8, 128], strides = [1, 1]} : vector<8x512xf32> to vector<8x128xf32>
    %34 = arith.negf %33 : vector<8x128xf32>
    %35 = math.exp %34 : vector<8x128xf32>
    %cst_19 = arith.constant 1.000000e+00 : f32
    %36 = vector.broadcast %cst_19 : f32 to vector<8x128xf32>
    %37 = arith.addf %36, %35 : vector<8x128xf32>
    %38 = arith.divf %36, %37 : vector<8x128xf32>
    %39 = arith.mulf %30, %12 : vector<8x128xf32>
    %40 = arith.mulf %24, %32 : vector<8x128xf32>
    %41 = arith.addf %39, %40 : vector<8x128xf32>
    %42 = math.tanh %41 : vector<8x128xf32>
    %43 = arith.mulf %38, %42 : vector<8x128xf32>
    %c1_i32 = arith.constant 1 : i32
    %c8_i32_20 = arith.constant 8 : i32
    %44 = arith.muli %c1_i32, %c8_i32_20 : i32
    %45 = tpu.assume_multiple %44, 8 : i32
    %46 = arith.index_cast %45 : i32 to index
    %c0_21 = arith.constant 0 : index
    %47 = vector.load %arg7[%46, %c0_21] : memref<64x512xf32, #tpu.memory_space<vmem>>, vector<8x512xf32>
    %cst_22 = arith.constant dense<0.000000e+00> : vector<8x512xf32>
    %48 = tpu.matmul %43, %10, %cst_22 {dimension_numbers = #tpu.dot_dimension_numbers<[1], [0], [0], [1], [0, 0, 1, 1], [], []>} : vector<8x128xf32>, vector<128x512xf32>, vector<8x512xf32> -> vector<8x512xf32>
    %49 = arith.addf %47, %48 : vector<8x512xf32>
    %50 = vector.extract_strided_slice %49 {offsets = [0, 0], sizes = [8, 128], strides = [1, 1]} : vector<8x512xf32> to vector<8x128xf32>
    %51 = arith.negf %50 : vector<8x128xf32>
    %52 = math.exp %51 : vector<8x128xf32>
    %cst_23 = arith.constant 1.000000e+00 : f32
    %53 = vector.broadcast %cst_23 : f32 to vector<8x128xf32>
    %54 = arith.addf %53, %52 : vector<8x128xf32>
    %55 = arith.divf %53, %54 : vector<8x128xf32>
    %56 = vector.extract_strided_slice %49 {offsets = [0, 128], sizes = [8, 128], strides = [1, 1]} : vector<8x512xf32> to vector<8x128xf32>
    %57 = arith.negf %56 : vector<8x128xf32>
    %58 = math.exp %57 : vector<8x128xf32>
    %cst_24 = arith.constant 1.000000e+00 : f32
    %59 = vector.broadcast %cst_24 : f32 to vector<8x128xf32>
    %60 = arith.addf %59, %58 : vector<8x128xf32>
    %61 = arith.divf %59, %60 : vector<8x128xf32>
    %62 = vector.extract_strided_slice %49 {offsets = [0, 256], sizes = [8, 128], strides = [1, 1]} : vector<8x512xf32> to vector<8x128xf32>
    %63 = math.tanh %62 : vector<8x128xf32>
    %64 = vector.extract_strided_slice %49 {offsets = [0, 384], sizes = [8, 128], strides = [1, 1]} : vector<8x512xf32> to vector<8x128xf32>
    %65 = arith.negf %64 : vector<8x128xf32>
    %66 = math.exp %65 : vector<8x128xf32>
    %cst_25 = arith.constant 1.000000e+00 : f32
    %67 = vector.broadcast %cst_25 : f32 to vector<8x128xf32>
    %68 = arith.addf %67, %66 : vector<8x128xf32>
    %69 = arith.divf %67, %68 : vector<8x128xf32>
    %70 = arith.mulf %61, %41 : vector<8x128xf32>
    %71 = arith.mulf %55, %63 : vector<8x128xf32>
    %72 = arith.addf %70, %71 : vector<8x128xf32>
    %73 = math.tanh %72 : vector<8x128xf32>
    %74 = arith.mulf %69, %73 : vector<8x128xf32>
    %c2_i32 = arith.constant 2 : i32
    %c8_i32_26 = arith.constant 8 : i32
    %75 = arith.muli %c2_i32, %c8_i32_26 : i32
    %76 = tpu.assume_multiple %75, 8 : i32
    %77 = arith.index_cast %76 : i32 to index
    %c0_27 = arith.constant 0 : index
    %78 = vector.load %arg7[%77, %c0_27] : memref<64x512xf32, #tpu.memory_space<vmem>>, vector<8x512xf32>
    %cst_28 = arith.constant dense<0.000000e+00> : vector<8x512xf32>
    %79 = tpu.matmul %74, %10, %cst_28 {dimension_numbers = #tpu.dot_dimension_numbers<[1], [0], [0], [1], [0, 0, 1, 1], [], []>} : vector<8x128xf32>, vector<128x512xf32>, vector<8x512xf32> -> vector<8x512xf32>
    %80 = arith.addf %78, %79 : vector<8x512xf32>
    %81 = vector.extract_strided_slice %80 {offsets = [0, 0], sizes = [8, 128], strides = [1, 1]} : vector<8x512xf32> to vector<8x128xf32>
    %82 = arith.negf %81 : vector<8x128xf32>
    %83 = math.exp %82 : vector<8x128xf32>
    %cst_29 = arith.constant 1.000000e+00 : f32
    %84 = vector.broadcast %cst_29 : f32 to vector<8x128xf32>
    %85 = arith.addf %84, %83 : vector<8x128xf32>
    %86 = arith.divf %84, %85 : vector<8x128xf32>
    %87 = vector.extract_strided_slice %80 {offsets = [0, 128], sizes = [8, 128], strides = [1, 1]} : vector<8x512xf32> to vector<8x128xf32>
    %88 = arith.negf %87 : vector<8x128xf32>
    %89 = math.exp %88 : vector<8x128xf32>
    %cst_30 = arith.constant 1.000000e+00 : f32
    %90 = vector.broadcast %cst_30 : f32 to vector<8x128xf32>
    %91 = arith.addf %90, %89 : vector<8x128xf32>
    %92 = arith.divf %90, %91 : vector<8x128xf32>
    %93 = vector.extract_strided_slice %80 {offsets = [0, 256], sizes = [8, 128], strides = [1, 1]} : vector<8x512xf32> to vector<8x128xf32>
    %94 = math.tanh %93 : vector<8x128xf32>
    %95 = vector.extract_strided_slice %80 {offsets = [0, 384], sizes = [8, 128], strides = [1, 1]} : vector<8x512xf32> to vector<8x128xf32>
    %96 = arith.negf %95 : vector<8x128xf32>
    %97 = math.exp %96 : vector<8x128xf32>
    %cst_31 = arith.constant 1.000000e+00 : f32
    %98 = vector.broadcast %cst_31 : f32 to vector<8x128xf32>
    %99 = arith.addf %98, %97 : vector<8x128xf32>
    %100 = arith.divf %98, %99 : vector<8x128xf32>
    %101 = arith.mulf %92, %72 : vector<8x128xf32>
    %102 = arith.mulf %86, %94 : vector<8x128xf32>
    %103 = arith.addf %101, %102 : vector<8x128xf32>
    %104 = math.tanh %103 : vector<8x128xf32>
    %105 = arith.mulf %100, %104 : vector<8x128xf32>
    %c3_i32 = arith.constant 3 : i32
    %c8_i32_32 = arith.constant 8 : i32
    %106 = arith.muli %c3_i32, %c8_i32_32 : i32
    %107 = tpu.assume_multiple %106, 8 : i32
    %108 = arith.index_cast %107 : i32 to index
    %c0_33 = arith.constant 0 : index
    %109 = vector.load %arg7[%108, %c0_33] : memref<64x512xf32, #tpu.memory_space<vmem>>, vector<8x512xf32>
    %cst_34 = arith.constant dense<0.000000e+00> : vector<8x512xf32>
    %110 = tpu.matmul %105, %10, %cst_34 {dimension_numbers = #tpu.dot_dimension_numbers<[1], [0], [0], [1], [0, 0, 1, 1], [], []>} : vector<8x128xf32>, vector<128x512xf32>, vector<8x512xf32> -> vector<8x512xf32>
    %111 = arith.addf %109, %110 : vector<8x512xf32>
    %112 = vector.extract_strided_slice %111 {offsets = [0, 0], sizes = [8, 128], strides = [1, 1]} : vector<8x512xf32> to vector<8x128xf32>
    %113 = arith.negf %112 : vector<8x128xf32>
    %114 = math.exp %113 : vector<8x128xf32>
    %cst_35 = arith.constant 1.000000e+00 : f32
    %115 = vector.broadcast %cst_35 : f32 to vector<8x128xf32>
    %116 = arith.addf %115, %114 : vector<8x128xf32>
    %117 = arith.divf %115, %116 : vector<8x128xf32>
    %118 = vector.extract_strided_slice %111 {offsets = [0, 128], sizes = [8, 128], strides = [1, 1]} : vector<8x512xf32> to vector<8x128xf32>
    %119 = arith.negf %118 : vector<8x128xf32>
    %120 = math.exp %119 : vector<8x128xf32>
    %cst_36 = arith.constant 1.000000e+00 : f32
    %121 = vector.broadcast %cst_36 : f32 to vector<8x128xf32>
    %122 = arith.addf %121, %120 : vector<8x128xf32>
    %123 = arith.divf %121, %122 : vector<8x128xf32>
    %124 = vector.extract_strided_slice %111 {offsets = [0, 256], sizes = [8, 128], strides = [1, 1]} : vector<8x512xf32> to vector<8x128xf32>
    %125 = math.tanh %124 : vector<8x128xf32>
    %126 = vector.extract_strided_slice %111 {offsets = [0, 384], sizes = [8, 128], strides = [1, 1]} : vector<8x512xf32> to vector<8x128xf32>
    %127 = arith.negf %126 : vector<8x128xf32>
    %128 = math.exp %127 : vector<8x128xf32>
    %cst_37 = arith.constant 1.000000e+00 : f32
    %129 = vector.broadcast %cst_37 : f32 to vector<8x128xf32>
    %130 = arith.addf %129, %128 : vector<8x128xf32>
    %131 = arith.divf %129, %130 : vector<8x128xf32>
    %132 = arith.mulf %123, %103 : vector<8x128xf32>
    %133 = arith.mulf %117, %125 : vector<8x128xf32>
    %134 = arith.addf %132, %133 : vector<8x128xf32>
    %135 = math.tanh %134 : vector<8x128xf32>
    %136 = arith.mulf %131, %135 : vector<8x128xf32>
    %c4_i32 = arith.constant 4 : i32
    %c8_i32_38 = arith.constant 8 : i32
    %137 = arith.muli %c4_i32, %c8_i32_38 : i32
    %138 = tpu.assume_multiple %137, 8 : i32
    %139 = arith.index_cast %138 : i32 to index
    %c0_39 = arith.constant 0 : index
    %140 = vector.load %arg7[%139, %c0_39] : memref<64x512xf32, #tpu.memory_space<vmem>>, vector<8x512xf32>
    %cst_40 = arith.constant dense<0.000000e+00> : vector<8x512xf32>
    %141 = tpu.matmul %136, %10, %cst_40 {dimension_numbers = #tpu.dot_dimension_numbers<[1], [0], [0], [1], [0, 0, 1, 1], [], []>} : vector<8x128xf32>, vector<128x512xf32>, vector<8x512xf32> -> vector<8x512xf32>
    %142 = arith.addf %140, %141 : vector<8x512xf32>
    %143 = vector.extract_strided_slice %142 {offsets = [0, 0], sizes = [8, 128], strides = [1, 1]} : vector<8x512xf32> to vector<8x128xf32>
    %144 = arith.negf %143 : vector<8x128xf32>
    %145 = math.exp %144 : vector<8x128xf32>
    %cst_41 = arith.constant 1.000000e+00 : f32
    %146 = vector.broadcast %cst_41 : f32 to vector<8x128xf32>
    %147 = arith.addf %146, %145 : vector<8x128xf32>
    %148 = arith.divf %146, %147 : vector<8x128xf32>
    %149 = vector.extract_strided_slice %142 {offsets = [0, 128], sizes = [8, 128], strides = [1, 1]} : vector<8x512xf32> to vector<8x128xf32>
    %150 = arith.negf %149 : vector<8x128xf32>
    %151 = math.exp %150 : vector<8x128xf32>
    %cst_42 = arith.constant 1.000000e+00 : f32
    %152 = vector.broadcast %cst_42 : f32 to vector<8x128xf32>
    %153 = arith.addf %152, %151 : vector<8x128xf32>
    %154 = arith.divf %152, %153 : vector<8x128xf32>
    %155 = vector.extract_strided_slice %142 {offsets = [0, 256], sizes = [8, 128], strides = [1, 1]} : vector<8x512xf32> to vector<8x128xf32>
    %156 = math.tanh %155 : vector<8x128xf32>
    %157 = vector.extract_strided_slice %142 {offsets = [0, 384], sizes = [8, 128], strides = [1, 1]} : vector<8x512xf32> to vector<8x128xf32>
    %158 = arith.negf %157 : vector<8x128xf32>
    %159 = math.exp %158 : vector<8x128xf32>
    %cst_43 = arith.constant 1.000000e+00 : f32
    %160 = vector.broadcast %cst_43 : f32 to vector<8x128xf32>
    %161 = arith.addf %160, %159 : vector<8x128xf32>
    %162 = arith.divf %160, %161 : vector<8x128xf32>
    %163 = arith.mulf %154, %134 : vector<8x128xf32>
    %164 = arith.mulf %148, %156 : vector<8x128xf32>
    %165 = arith.addf %163, %164 : vector<8x128xf32>
    %166 = math.tanh %165 : vector<8x128xf32>
    %167 = arith.mulf %162, %166 : vector<8x128xf32>
    %c5_i32 = arith.constant 5 : i32
    %c8_i32_44 = arith.constant 8 : i32
    %168 = arith.muli %c5_i32, %c8_i32_44 : i32
    %169 = tpu.assume_multiple %168, 8 : i32
    %170 = arith.index_cast %169 : i32 to index
    %c0_45 = arith.constant 0 : index
    %171 = vector.load %arg7[%170, %c0_45] : memref<64x512xf32, #tpu.memory_space<vmem>>, vector<8x512xf32>
    %cst_46 = arith.constant dense<0.000000e+00> : vector<8x512xf32>
    %172 = tpu.matmul %167, %10, %cst_46 {dimension_numbers = #tpu.dot_dimension_numbers<[1], [0], [0], [1], [0, 0, 1, 1], [], []>} : vector<8x128xf32>, vector<128x512xf32>, vector<8x512xf32> -> vector<8x512xf32>
    %173 = arith.addf %171, %172 : vector<8x512xf32>
    %174 = vector.extract_strided_slice %173 {offsets = [0, 0], sizes = [8, 128], strides = [1, 1]} : vector<8x512xf32> to vector<8x128xf32>
    %175 = arith.negf %174 : vector<8x128xf32>
    %176 = math.exp %175 : vector<8x128xf32>
    %cst_47 = arith.constant 1.000000e+00 : f32
    %177 = vector.broadcast %cst_47 : f32 to vector<8x128xf32>
    %178 = arith.addf %177, %176 : vector<8x128xf32>
    %179 = arith.divf %177, %178 : vector<8x128xf32>
    %180 = vector.extract_strided_slice %173 {offsets = [0, 128], sizes = [8, 128], strides = [1, 1]} : vector<8x512xf32> to vector<8x128xf32>
    %181 = arith.negf %180 : vector<8x128xf32>
    %182 = math.exp %181 : vector<8x128xf32>
    %cst_48 = arith.constant 1.000000e+00 : f32
    %183 = vector.broadcast %cst_48 : f32 to vector<8x128xf32>
    %184 = arith.addf %183, %182 : vector<8x128xf32>
    %185 = arith.divf %183, %184 : vector<8x128xf32>
    %186 = vector.extract_strided_slice %173 {offsets = [0, 256], sizes = [8, 128], strides = [1, 1]} : vector<8x512xf32> to vector<8x128xf32>
    %187 = math.tanh %186 : vector<8x128xf32>
    %188 = vector.extract_strided_slice %173 {offsets = [0, 384], sizes = [8, 128], strides = [1, 1]} : vector<8x512xf32> to vector<8x128xf32>
    %189 = arith.negf %188 : vector<8x128xf32>
    %190 = math.exp %189 : vector<8x128xf32>
    %cst_49 = arith.constant 1.000000e+00 : f32
    %191 = vector.broadcast %cst_49 : f32 to vector<8x128xf32>
    %192 = arith.addf %191, %190 : vector<8x128xf32>
    %193 = arith.divf %191, %192 : vector<8x128xf32>
    %194 = arith.mulf %185, %165 : vector<8x128xf32>
    %195 = arith.mulf %179, %187 : vector<8x128xf32>
    %196 = arith.addf %194, %195 : vector<8x128xf32>
    %197 = math.tanh %196 : vector<8x128xf32>
    %198 = arith.mulf %193, %197 : vector<8x128xf32>
    %c6_i32 = arith.constant 6 : i32
    %c8_i32_50 = arith.constant 8 : i32
    %199 = arith.muli %c6_i32, %c8_i32_50 : i32
    %200 = tpu.assume_multiple %199, 8 : i32
    %201 = arith.index_cast %200 : i32 to index
    %c0_51 = arith.constant 0 : index
    %202 = vector.load %arg7[%201, %c0_51] : memref<64x512xf32, #tpu.memory_space<vmem>>, vector<8x512xf32>
    %cst_52 = arith.constant dense<0.000000e+00> : vector<8x512xf32>
    %203 = tpu.matmul %198, %10, %cst_52 {dimension_numbers = #tpu.dot_dimension_numbers<[1], [0], [0], [1], [0, 0, 1, 1], [], []>} : vector<8x128xf32>, vector<128x512xf32>, vector<8x512xf32> -> vector<8x512xf32>
    %204 = arith.addf %202, %203 : vector<8x512xf32>
    %205 = vector.extract_strided_slice %204 {offsets = [0, 0], sizes = [8, 128], strides = [1, 1]} : vector<8x512xf32> to vector<8x128xf32>
    %206 = arith.negf %205 : vector<8x128xf32>
    %207 = math.exp %206 : vector<8x128xf32>
    %cst_53 = arith.constant 1.000000e+00 : f32
    %208 = vector.broadcast %cst_53 : f32 to vector<8x128xf32>
    %209 = arith.addf %208, %207 : vector<8x128xf32>
    %210 = arith.divf %208, %209 : vector<8x128xf32>
    %211 = vector.extract_strided_slice %204 {offsets = [0, 128], sizes = [8, 128], strides = [1, 1]} : vector<8x512xf32> to vector<8x128xf32>
    %212 = arith.negf %211 : vector<8x128xf32>
    %213 = math.exp %212 : vector<8x128xf32>
    %cst_54 = arith.constant 1.000000e+00 : f32
    %214 = vector.broadcast %cst_54 : f32 to vector<8x128xf32>
    %215 = arith.addf %214, %213 : vector<8x128xf32>
    %216 = arith.divf %214, %215 : vector<8x128xf32>
    %217 = vector.extract_strided_slice %204 {offsets = [0, 256], sizes = [8, 128], strides = [1, 1]} : vector<8x512xf32> to vector<8x128xf32>
    %218 = math.tanh %217 : vector<8x128xf32>
    %219 = vector.extract_strided_slice %204 {offsets = [0, 384], sizes = [8, 128], strides = [1, 1]} : vector<8x512xf32> to vector<8x128xf32>
    %220 = arith.negf %219 : vector<8x128xf32>
    %221 = math.exp %220 : vector<8x128xf32>
    %cst_55 = arith.constant 1.000000e+00 : f32
    %222 = vector.broadcast %cst_55 : f32 to vector<8x128xf32>
    %223 = arith.addf %222, %221 : vector<8x128xf32>
    %224 = arith.divf %222, %223 : vector<8x128xf32>
    %225 = arith.mulf %216, %196 : vector<8x128xf32>
    %226 = arith.mulf %210, %218 : vector<8x128xf32>
    %227 = arith.addf %225, %226 : vector<8x128xf32>
    %228 = math.tanh %227 : vector<8x128xf32>
    %229 = arith.mulf %224, %228 : vector<8x128xf32>
    %c7_i32 = arith.constant 7 : i32
    %c8_i32_56 = arith.constant 8 : i32
    %230 = arith.muli %c7_i32, %c8_i32_56 : i32
    %231 = tpu.assume_multiple %230, 8 : i32
    %232 = arith.index_cast %231 : i32 to index
    %c0_57 = arith.constant 0 : index
    %233 = vector.load %arg7[%232, %c0_57] : memref<64x512xf32, #tpu.memory_space<vmem>>, vector<8x512xf32>
    %cst_58 = arith.constant dense<0.000000e+00> : vector<8x512xf32>
    %234 = tpu.matmul %229, %10, %cst_58 {dimension_numbers = #tpu.dot_dimension_numbers<[1], [0], [0], [1], [0, 0, 1, 1], [], []>} : vector<8x128xf32>, vector<128x512xf32>, vector<8x512xf32> -> vector<8x512xf32>
    %235 = arith.addf %233, %234 : vector<8x512xf32>
    %236 = vector.extract_strided_slice %235 {offsets = [0, 0], sizes = [8, 128], strides = [1, 1]} : vector<8x512xf32> to vector<8x128xf32>
    %237 = arith.negf %236 : vector<8x128xf32>
    %238 = math.exp %237 : vector<8x128xf32>
    %cst_59 = arith.constant 1.000000e+00 : f32
    %239 = vector.broadcast %cst_59 : f32 to vector<8x128xf32>
    %240 = arith.addf %239, %238 : vector<8x128xf32>
    %241 = arith.divf %239, %240 : vector<8x128xf32>
    %242 = vector.extract_strided_slice %235 {offsets = [0, 128], sizes = [8, 128], strides = [1, 1]} : vector<8x512xf32> to vector<8x128xf32>
    %243 = arith.negf %242 : vector<8x128xf32>
    %244 = math.exp %243 : vector<8x128xf32>
    %cst_60 = arith.constant 1.000000e+00 : f32
    %245 = vector.broadcast %cst_60 : f32 to vector<8x128xf32>
    %246 = arith.addf %245, %244 : vector<8x128xf32>
    %247 = arith.divf %245, %246 : vector<8x128xf32>
    %248 = vector.extract_strided_slice %235 {offsets = [0, 256], sizes = [8, 128], strides = [1, 1]} : vector<8x512xf32> to vector<8x128xf32>
    %249 = math.tanh %248 : vector<8x128xf32>
    %250 = vector.extract_strided_slice %235 {offsets = [0, 384], sizes = [8, 128], strides = [1, 1]} : vector<8x512xf32> to vector<8x128xf32>
    %251 = arith.negf %250 : vector<8x128xf32>
    %252 = math.exp %251 : vector<8x128xf32>
    %cst_61 = arith.constant 1.000000e+00 : f32
    %253 = vector.broadcast %cst_61 : f32 to vector<8x128xf32>
    %254 = arith.addf %253, %252 : vector<8x128xf32>
    %255 = arith.divf %253, %254 : vector<8x128xf32>
    %256 = arith.mulf %247, %227 : vector<8x128xf32>
    %257 = arith.mulf %241, %249 : vector<8x128xf32>
    %258 = arith.addf %256, %257 : vector<8x128xf32>
    %259 = math.tanh %258 : vector<8x128xf32>
    %260 = arith.mulf %255, %259 : vector<8x128xf32>
    %c8_i32_62 = arith.constant 8 : i32
    %c0_63 = arith.constant 0 : index
    %c0_64 = arith.constant 0 : index
    %261 = vector.load %arg5[%c0_63, %c0_64] : memref<8x128xf32, #tpu.memory_space<vmem>>, vector<8x128xf32>
    tpu.vector_store %arg5[%c0_63, %c0_64], %260 {strides = array<i32>} : memref<8x128xf32, #tpu.memory_space<vmem>>, vector<8x128xf32>,
    %c0_65 = arith.constant 0 : index
    %c0_66 = arith.constant 0 : index
    %262 = vector.load %arg6[%c0_65, %c0_66] : memref<8x128xf32, #tpu.memory_space<vmem>>, vector<8x128xf32>
    tpu.vector_store %arg6[%c0_65, %c0_66], %258 {strides = array<i32>} : memref<8x128xf32, #tpu.memory_space<vmem>>, vector<8x128xf32>,
    return
  }
  func.func @transform_0(%arg0: i32) -> (i32, i32) {
    %c0_i32 = arith.constant 0 : i32
    %c0_i32_0 = arith.constant 0 : i32
    return %arg0, %c0_i32 : i32, i32
  }
  func.func @transform_1(%arg0: i32) -> (i32, i32) {
    %c0_i32 = arith.constant 0 : i32
    %c0_i32_0 = arith.constant 0 : i32
    %c0_i32_1 = arith.constant 0 : i32
    return %c0_i32, %c0_i32_0 : i32, i32
  }
  func.func @transform_2(%arg0: i32) -> (i32, i32) {
    %c0_i32 = arith.constant 0 : i32
    %c0_i32_0 = arith.constant 0 : i32
    %c0_i32_1 = arith.constant 0 : i32
    return %c0_i32, %c0_i32_0 : i32, i32
  }
  func.func @transform_3(%arg0: i32) -> (i32, i32) {
    %c0_i32 = arith.constant 0 : i32
    %c0_i32_0 = arith.constant 0 : i32
    %c0_i32_1 = arith.constant 0 : i32
    return %c0_i32, %c0_i32_0 : i32, i32
  }
  func.func @transform_4(%arg0: i32) -> (i32, i32) {
    %c0_i32 = arith.constant 0 : i32
    %c0_i32_0 = arith.constant 0 : i32
    %c0_i32_1 = arith.constant 0 : i32
    return %c0_i32, %c0_i32_0 : i32, i32
  }
  func.func @transform_5(%arg0: i32) -> (i32, i32) {
    %c0_i32 = arith.constant 0 : i32
    %c0_i32_0 = arith.constant 0 : i32
    %c0_i32_1 = arith.constant 0 : i32
    return %c0_i32, %c0_i32_0 : i32, i32
  }
}

</mosaic_0001>

<bundles_post_ra>
// kernel: tpu_custom_call.1
= control target key start
LH: loop header
LB: loop body
LE: loop exit
PB: predicated region body
PF: predicated region fallthrough
CT: control target
= control target key end

     0   :  { %11 = vsyncpa [#allocation4], 0  ;;  %s2920_s0 = inlined_call_operand.vmem [shape: bf16[64,4], index: 0, kind: input, shape index: {}]   ;;  %s2921_s1 = inlined_call_operand.vmem [shape: bf16[4,512], index: 1, kind: input, shape index: {}]   ;;  %s2922_s2 = inlined_call_operand.hbm [shape: f32[128,512], index: 2, kind: input, shape index: {}]   ;;  %s2923_s3 = inlined_call_operand.vmem [shape: f32[1,512], index: 3, kind: input, shape index: {}]   ;;  %s2924_s4 = inlined_call_operand.hbm [shape: f32[8,128], index: 4, kind: output, shape index: {0}]   ;;  %s2925_s5 = inlined_call_operand.hbm [shape: f32[8,128], index: 5, kind: output, shape index: {1}]  }
   0x1   :  { %12 = vsyncpa [#allocation5], 0 }
   0x2   :  { %13 = vsyncpa [#allocation8], 0  ;;  %s22_s20 = sshll.u32 %s2922_s2, 4  ;;  %s1935_s21 = smov [#allocation3]   ;;  %s23_s20 = int_to_ptr.hbm [resolvable:$true] %s22_s20 }
   0x3   :  { %s24_s22 = sshll.u32 %s1935_s21, 4  ;;  %s1936_s23 = smov 512   ;;  %s25_s22 = int_to_ptr.vmem [resolvable:$true] %s24_s22 }
   0x4   :  { %s1937_s24 = smov 32  }
   0x5   :  { %30 = dma.hbm_to_vmem [thread:$0]  %s23_s20, 8192, %s25_s22, [#allocation4], %s1936_s23, %s1936_s23, %s1937_s24  }
   0x6   :  { %1929 = dma.done.wait [#allocation4], 8192  }
   0x7   :  { %1930 = vsyncadd [#allocation4], 4294959104  ;;  %v52_v0 = vld [vmem:[%s2921_s1] sm:$0xff]  ;;  %vm102_vm0 = vcmask 1041408   ;;  %v1980_v2 = vld [vmem:[#allocation3 + $0x1e0] sm:$0xff]  ;;  %vm89_vm1 = vcmask 31744  }
   0x8   :  { %84 = vst [vmem:[#allocation1] ss:$4 sm:$0xff] %v52_v0  ;;  %v1655_v1 = vld [vmem:[%s2920_s0] sm:$0xff]  ;;  %v1982_v8 = vld [vmem:[#allocation3 + $0x1e8] sm:$0xff]  ;;  %v1985_v12 = vld [vmem:[#allocation3 + $0x1c0] sm:$0xff]  ;;  %s1577_s12 = sshll.u32 %s2925_s5, 4  ;;  %s1578_s12 = int_to_ptr.hbm [resolvable:$true] %s1577_s12 }
   0x9   :  { %v1988_v13 = vld [vmem:[#allocation3 + $0x1c8] sm:$0xff]  ;;  %v1992_v14 = vld [vmem:[#allocation3 + $0x1f8] sm:$0xff]  ;;  %v1994_v15 = vld [vmem:[#allocation3 + $0x1a0] sm:$0xff]  ;;  %s1940_s13 = smov [#allocation6]   ;;  %s1566_s16 = sshll.u32 %s2924_s4, 4  ;;  %s1567_s16 = int_to_ptr.hbm [resolvable:$true] %s1566_s16 }
   0xa   :  { %v1998_v16 = vld [vmem:[#allocation3 + $0x1a8] sm:$0xff]  ;;  %v2000_v17 = vld [vmem:[#allocation3 + $0x1f0] sm:$0xff]  ;;  %v2004_v18 = vld [vmem:[#allocation3 + $0x1d8] sm:$0xff]  ;;  %s1564_s14 = sshll.u32 %s1940_s13, 4  ;;  %s1565_s14 = int_to_ptr.vmem [resolvable:$true] %s1564_s14 }
   0xb   :  { %v2006_v19 = vld [vmem:[#allocation3 + $0x180] sm:$0xff]  ;;  %v2010_v20 = vld [vmem:[#allocation3 + $0x188] sm:$0xff]  ;;  %v2012_v21 = vld [vmem:[#allocation3 + $0x1d0] sm:$0xff] }
   0xc   :  { %v2015_v22 = vld [vmem:[#allocation3 + $0x1b8] sm:$0xff]  ;;  %v2018_v23 = vld [vmem:[#allocation3 + $0x160] sm:$0xff]  ;;  %v2022_v24 = vld [vmem:[#allocation3 + $0x168] sm:$0xff] }
   0xd   :  { %v2024_v25 = vld [vmem:[#allocation3 + $0x1b0] sm:$0xff]  ;;  %v2027_v26 = vld [vmem:[#allocation3 + $0x198] sm:$0xff]  ;;  %v2030_v27 = vld [vmem:[#allocation3 + $0x140] sm:$0xff] }
   0xe   :  { %v2034_v28 = vld [vmem:[#allocation3 + $0x148] sm:$0xff]  ;;  %v2036_v29 = vld [vmem:[#allocation3 + $0x190] sm:$0xff]  ;;  %v2039_v30 = vld [vmem:[#allocation3 + $0x178] sm:$0xff] }
   0xf   :  { %v85_v3 = vld.sshfl [vmem:[#allocation1] sm:$0xff pattern:$0x73625140]  ;;  %v86_v4 = vld.sshfl [vmem:[#allocation1 + $0x8] sm:$0xff pattern:$0x73625140] }
  0x10   :  { %v103_v5 = vsel %vm102_vm0, %v85_v3, 0  ;;  %v105_v6 = vsel %vm102_vm0, %v86_v4, 0  ;;  %v87_v7 = vld.sshfl [vmem:[#allocation1 + $0x10] sm:$0xff pattern:$0x73625140]  ;;  %v2042_v31 = vld [vmem:[#allocation3 + $0x120] sm:$0xff] }
  0x11   :  { %118 = vmatpush.bf16.msra.mxu0 %v103_v5  ;;  %147 = vmatpush.bf16.msra.mxu1 %v105_v6  ;;  %v107_v9 = vsel %vm102_vm0, %v87_v7, 0  ;;  %v88_v10 = vld.sshfl [vmem:[#allocation1 + $0x18] sm:$0xff pattern:$0x73625140]  ;;  %v2046_v32 = vld [vmem:[#allocation3 + $0x128] sm:$0xff]  ;;  %v2051_v34 = vld [vmem:[#allocation3 + $0x158] sm:$0xff] }
  0x12   :  { %176 = vmatpush.bf16.msra.mxu2 %v107_v9  ;;  %v109_v11 = vsel %vm102_vm0, %v88_v10, 0  ;;  %v2048_v33 = vld [vmem:[#allocation3 + $0x170] sm:$0xff]  ;;  %v2054_v35 = vld [vmem:[#allocation3 + $0x100] sm:$0xff]  ;;  %v2058_v36 = vld [vmem:[#allocation3 + $0x108] sm:$0xff] }
  0x13   :  { %205 = vmatpush.bf16.msra.mxu3 %v109_v11  ;;  %v2060_v37 = vld [vmem:[#allocation3 + $0x150] sm:$0xff]  ;;  %v1656_v38 = vld [vmem:[%s2920_s0 + $0x8] sm:$0xff]  ;;  %v2066_v39 = vld [vmem:[#allocation3 + $0x138] sm:$0xff] }
  0x14   :  { %1615 = vmatmul.msk.bf16.vlgmr.msra.gmra.mxu0 %vm89_vm1, %v1655_v1  ;;  %1619 = vmatmul.msk.bf16.vlgmr.msra.gmra.mxu1 %vm89_vm1, %v1655_v1  ;;  %v2069_v40 = vld [vmem:[#allocation3 + $0xe0] sm:$0xff]  ;;  %v2074_v41 = vld [vmem:[#allocation3 + $0xe8] sm:$0xff]  ;;  %v2083_v43 = vld [vmem:[#allocation3 + $0x118] sm:$0xff] }
  0x15   :  { %332 = vmatpush.msrb.mxu0 %v1980_v2  ;;  %352 = vmatpush.msrb.mxu1 %v1982_v8  ;;  %v2079_v42 = vld [vmem:[#allocation3 + $0xc0] sm:$0xff]  ;;  %v2085_v44 = vld [vmem:[#allocation3 + $0xc8] sm:$0xff]  ;;  %v2089_v45 = vld [vmem:[#allocation3 + $0x130] sm:$0xff] }
  0x16   :  { %1623 = vmatmul.msk.bf16.vlgmr.msra.gmra.mxu2 %vm89_vm1, %v1655_v1  ;;  %1627 = vmatmul.msk.bf16.vlgmr.msra.gmra.mxu3 %vm89_vm1, %v1655_v1  ;;  %v2091_v46 = vld [vmem:[#allocation3 + $0xa0] sm:$0xff]  ;;  %v2095_v47 = vld [vmem:[#allocation3 + $0xf8] sm:$0xff]  ;;  %v2097_v48 = vld [vmem:[#allocation3 + $0xa8] sm:$0xff] }
  0x17   :  { %333 = vmatpush.msrb.mxu0 %v1985_v12  ;;  %353 = vmatpush.msrb.mxu1 %v1988_v13  ;;  %3016 = vst [vmem:[#allocation12_spill] sm:$0xff] %v2091_v46  ;;  %v2101_v49 = vld [vmem:[#allocation3 + $0x110] sm:$0xff]  ;;  %v2103_v50 = vld [vmem:[#allocation3 + $0x80] sm:$0xff]  ;;  %v2107_v51 = vld [vmem:[#allocation3 + $0xd8] sm:$0xff] }
  0x18   :  { %392 = vmatpush.msrb.mxu3 %v1992_v14  ;;  %372 = vmatpush.msrb.mxu2 %v2000_v17  ;;  %3017 = vst [vmem:[#allocation13_spill] sm:$0xff] %v2097_v48  ;;  %v2109_v52 = vld [vmem:[#allocation3 + $0x88] sm:$0xff]  ;;  %v2113_v53 = vld [vmem:[#allocation3 + $0xf0] sm:$0xff]  ;;  %v2115_v54 = vld [vmem:[#allocation3 + $0x60] sm:$0xff] }
  0x19   :  { %334 = vmatpush.msrb.mxu0 %v1994_v15  ;;  %354 = vmatpush.msrb.mxu1 %v1998_v16  ;;  %3018 = vst [vmem:[#allocation14_spill] sm:$0xff] %v2103_v50  ;;  %v2119_v55 = vld [vmem:[#allocation3 + $0xb8] sm:$0xff]  ;;  %v2121_v56 = vld [vmem:[#allocation3 + $0x68] sm:$0xff]  ;;  %v2125_v57 = vld [vmem:[#allocation3 + $0xd0] sm:$0xff] }
  0x1a   :  { %393 = vmatpush.msrb.mxu3 %v2004_v18  ;;  %373 = vmatpush.msrb.mxu2 %v2012_v21  ;;  %3019 = vst [vmem:[#allocation15_spill] sm:$0xff] %v2107_v51  ;;  %v2127_v58 = vld [vmem:[#allocation3 + $0x40] sm:$0xff]  ;;  %v2131_v59 = vld [vmem:[#allocation3 + $0x98] sm:$0xff]  ;;  %v2133_v60 = vld [vmem:[#allocation3 + $0x48] sm:$0xff] }
  0x1b   :  { %335 = vmatpush.msrb.mxu0 %v2006_v19  ;;  %355 = vmatpush.msrb.mxu1 %v2010_v20  ;;  %3020 = vst [vmem:[#allocation16_spill] sm:$0xff] %v2109_v52  ;;  %v2137_v61 = vld [vmem:[#allocation3 + $0xb0] sm:$0xff]  ;;  %v2139_v62 = vld [vmem:[#allocation3 + $0x20] sm:$0xff]  ;;  %v2143_v63 = vld [vmem:[#allocation3 + $0x78] sm:$0xff] }
  0x1c   :  { %394 = vmatpush.msrb.mxu3 %v2015_v22  ;;  %374 = vmatpush.msrb.mxu2 %v2024_v25  ;;  %3021 = vst [vmem:[#allocation17_spill] sm:$0xff] %v2115_v54  ;;  %v2145_v0 = vld [vmem:[#allocation3 + $0x28] sm:$0xff]  ;;  %v2149_v1 = vld [vmem:[#allocation3 + $0x90] sm:$0xff]  ;;  %v2151_v3 = vld [vmem:[#allocation3] sm:$0xff] }
  0x1d   :  { %336 = vmatpush.msrb.mxu0 %v2018_v23  ;;  %356 = vmatpush.msrb.mxu1 %v2022_v24  ;;  %3022 = vst [vmem:[#allocation18_spill] sm:$0xff] %v2119_v55  ;;  %v1657_v4 = vld [vmem:[%s2920_s0 + $0x10] sm:$0xff]  ;;  %v2158_v5 = vld [vmem:[#allocation3 + $0x58] sm:$0xff]  ;;  %v2168_v9 = vld [vmem:[#allocation3 + $0x70] sm:$0xff] }
  0x1e   :  { %395 = vmatpush.msrb.mxu3 %v2027_v26  ;;  %375 = vmatpush.msrb.mxu2 %v2036_v29  ;;  %3023 = vst [vmem:[#allocation19_spill] sm:$0xff] %v2121_v56  ;;  %v2160_v6 = vld [vmem:[#allocation3 + $0x8] sm:$0xff]  ;;  %v2166_v7 = vld [vmem:[#allocation3 + $0x38] sm:$0xff]  ;;  %v2177_v11 = vld [vmem:[#allocation3 + $0x50] sm:$0xff] }
  0x1f   :  { %337 = vmatpush.msrb.mxu0 %v2030_v27  ;;  %357 = vmatpush.msrb.mxu1 %v2034_v28  ;;  %3024 = vst [vmem:[#allocation20_spill] sm:$0xff] %v2127_v58  ;;  %v2174_v10 = vld [vmem:[#allocation3 + $0x18] sm:$0xff] }
  0x20   :  { %396 = vmatpush.msrb.mxu3 %v2039_v30  ;;  %376 = vmatpush.msrb.mxu2 %v2048_v33  ;;  %3025 = vst [vmem:[#allocation21_spill] sm:$0xff] %v2131_v59 }
  0x21   :  { %338 = vmatpush.msrb.mxu0 %v2042_v31  ;;  %358 = vmatpush.msrb.mxu1 %v2046_v32  ;;  %3026 = vst [vmem:[#allocation22_spill] sm:$0xff] %v2133_v60 }
  0x22   :  { %397 = vmatpush.msrb.mxu3 %v2051_v34  ;;  %377 = vmatpush.msrb.mxu2 %v2060_v37  ;;  %3027 = vst [vmem:[#allocation23_spill] sm:$0xff] %v2137_v61 }
  0x23   :  { %339 = vmatpush.msrb.mxu0 %v2054_v35  ;;  %359 = vmatpush.msrb.mxu1 %v2058_v36  ;;  %3028 = vst [vmem:[#allocation24_spill] sm:$0xff] %v2139_v62 }
  0x24   :  { %398 = vmatpush.msrb.mxu3 %v2066_v39  ;;  %1616 = vmatmul.msk.bf16.gmra.mxu0 %vm89_vm1, %v1656_v38  ;;  %3029 = vst [vmem:[#allocation25_spill] sm:$0xff] %v2143_v63 }
  0x25   :  { %340 = vmatpush.msrb.mxu0 %v2069_v40  ;;  %1620 = vmatmul.msk.bf16.gmra.mxu1 %vm89_vm1, %v1656_v38  ;;  %3030 = vst [vmem:[#allocation26_spill] sm:$0xff] %v2145_v0 }
  0x26   :  { %1624 = vmatmul.msk.bf16.gmra.mxu2 %vm89_vm1, %v1656_v38  ;;  %360 = vmatpush.msrb.mxu1 %v2074_v41  ;;  %3031 = vst [vmem:[#allocation27_spill] sm:$0xff] %v2149_v1 }
  0x27   :  { %1628 = vmatmul.msk.bf16.gmra.mxu3 %vm89_vm1, %v1656_v38  ;;  %341 = vmatpush.msrb.mxu0 %v2079_v42  ;;  %3032 = vst [vmem:[#allocation28_spill] sm:$0xff] %v2151_v3  ;;  %v2182_v38 = vld [vmem:[#allocation3 + $0x30] sm:$0xff] }
  0x28   :  { %399 = vmatpush.msrb.mxu3 %v2083_v43  ;;  %361 = vmatpush.msrb.mxu1 %v2085_v44  ;;  %3033 = vst [vmem:[#allocation29_spill] sm:$0xff] %v2158_v5 }
  0x29   :  { %378 = vmatpush.msrb.mxu2 %v2089_v45  ;;  %342 = vmatpush.msrb.mxu0 %v2091_v46  ;;  %3034 = vst [vmem:[#allocation30_spill] sm:$0xff] %v2160_v6 }
  0x2a   :  { %400 = vmatpush.msrb.mxu3 %v2095_v47  ;;  %362 = vmatpush.msrb.mxu1 %v2097_v48  ;;  %3035 = vst [vmem:[#allocation31_spill] sm:$0xff] %v2166_v7 }
  0x2b   :  { %379 = vmatpush.msrb.mxu2 %v2101_v49  ;;  %343 = vmatpush.msrb.mxu0 %v2103_v50  ;;  %3036 = vst [vmem:[#allocation32_spill] sm:$0xff] %v2168_v9 }
  0x2c   :  { %401 = vmatpush.msrb.mxu3 %v2107_v51  ;;  %363 = vmatpush.msrb.mxu1 %v2109_v52  ;;  %3037 = vst [vmem:[#allocation33_spill] sm:$0xff] %v2174_v10 }
  0x2d   :  { %380 = vmatpush.msrb.mxu2 %v2113_v53  ;;  %344 = vmatpush.msrb.mxu0 %v2115_v54  ;;  %3038 = vst [vmem:[#allocation34_spill] sm:$0xff] %v2177_v11 }
  0x2e   :  { %402 = vmatpush.msrb.mxu3 %v2119_v55  ;;  %364 = vmatpush.msrb.mxu1 %v2121_v56  ;;  %3039 = vst [vmem:[#allocation35_spill] sm:$0xff] %v2182_v38 }
  0x2f   :  { %381 = vmatpush.msrb.mxu2 %v2125_v57  ;;  %345 = vmatpush.msrb.mxu0 %v2127_v58 }
  0x30   :  { %403 = vmatpush.msrb.mxu3 %v2131_v59  ;;  %365 = vmatpush.msrb.mxu1 %v2133_v60 }
  0x31   :  { %382 = vmatpush.msrb.mxu2 %v2137_v61  ;;  %346 = vmatpush.msrb.mxu0 %v2139_v62 }
  0x32   :  { %404 = vmatpush.msrb.mxu3 %v2143_v63  ;;  %366 = vmatpush.msrb.mxu1 %v2145_v0 }
  0x33   :  { %383 = vmatpush.msrb.mxu2 %v2149_v1  ;;  %347 = vmatpush.msrb.mxu0 %v2151_v3 }
  0x34   :  { %405 = vmatpush.msrb.mxu3 %v2158_v5  ;;  %367 = vmatpush.msrb.mxu1 %v2160_v6  ;;  %v2188_v6 = vld [vmem:[#allocation3 + $0x10] sm:$0xff] }
  0x35   :  { %1617 = vmatmul.msk.bf16.gmra.mxu0 %vm89_vm1, %v1657_v4  ;;  %1621 = vmatmul.msk.bf16.gmra.mxu1 %vm89_vm1, %v1657_v4  ;;  %3040 = vst [vmem:[#allocation36_spill] sm:$0xff] %v2188_v6 }
  0x36   :  { %1625 = vmatmul.msk.bf16.gmra.mxu2 %vm89_vm1, %v1657_v4  ;;  %406 = vmatpush.msrb.mxu3 %v2166_v7 }
  0x37   :  { %1629 = vmatmul.msk.bf16.gmra.mxu3 %vm89_vm1, %v1657_v4  ;;  %384 = vmatpush.msrb.mxu2 %v2168_v9  ;;  %v1658_v4 = vld [vmem:[%s2920_s0 + $0x18] sm:$0xff] }
  0x38   :  { %407 = vmatpush.msrb.mxu3 %v2174_v10  ;;  %486 = vmatpush.msra.mxu0 %v1980_v2 }
  0x39   :  { %385 = vmatpush.msrb.mxu2 %v2177_v11  ;;  %506 = vmatpush.msra.mxu1 %v1982_v8 }
  0x3a   :  { %546 = vmatpush.msra.mxu3 %v1992_v14  ;;  %487 = vmatpush.msra.mxu0 %v1985_v12 }
  0x3b   :  { %386 = vmatpush.msrb.mxu2 %v2182_v38  ;;  %507 = vmatpush.msra.mxu1 %v1988_v13 }
  0x3c   :  { %547 = vmatpush.msra.mxu3 %v2004_v18  ;;  %488 = vmatpush.msra.mxu0 %v1994_v15 }
  0x3d   :  { %387 = vmatpush.msrb.mxu2 %v2188_v6  ;;  %508 = vmatpush.msra.mxu1 %v1998_v16 }
  0x3e   :  { %548 = vmatpush.msra.mxu3 %v2015_v22  ;;  %489 = vmatpush.msra.mxu0 %v2006_v19 }
  0x3f   :  { %526 = vmatpush.msra.mxu2 %v2000_v17  ;;  %509 = vmatpush.msra.mxu1 %v2010_v20 }
  0x40   :  { %549 = vmatpush.msra.mxu3 %v2027_v26  ;;  %490 = vmatpush.msra.mxu0 %v2018_v23 }
  0x41   :  { %527 = vmatpush.msra.mxu2 %v2012_v21  ;;  %510 = vmatpush.msra.mxu1 %v2022_v24 }
  0x42   :  { %550 = vmatpush.msra.mxu3 %v2039_v30  ;;  %491 = vmatpush.msra.mxu0 %v2030_v27 }
  0x43   :  { %528 = vmatpush.msra.mxu2 %v2024_v25  ;;  %511 = vmatpush.msra.mxu1 %v2034_v28 }
  0x44   :  { %551 = vmatpush.msra.mxu3 %v2051_v34  ;;  %492 = vmatpush.msra.mxu0 %v2042_v31 }
  0x45   :  { %529 = vmatpush.msra.mxu2 %v2036_v29  ;;  %1618 = vmatmul.msk.bf16.gmra.mxu0 %vm89_vm1, %v1658_v4 }
  0x46   :  { %1622 = vmatmul.msk.bf16.gmra.mxu1 %vm89_vm1, %v1658_v4  ;;  %1626 = vmatmul.msk.bf16.gmra.mxu2 %vm89_vm1, %v1658_v4 }
  0x47   :  { %1630 = vmatmul.msk.bf16.gmra.mxu3 %vm89_vm1, %v1658_v4  ;;  %530 = vmatpush.msra.mxu2 %v2048_v33  ;;  %v1938_v4 = vmov 0.0  }
  0x48   :  { %512 = vmatpush.msra.mxu1 %v2046_v32  ;;  %552 = vmatpush.msra.mxu3 %v2066_v39 }
  0x49   :  { %531 = vmatpush.msra.mxu2 %v2060_v37  ;;  %493 = vmatpush.msra.mxu0 %v2054_v35 }
  0x4a   :  { %513 = vmatpush.msra.mxu1 %v2058_v36  ;;  %553 = vmatpush.msra.mxu3 %v2083_v43 }
  0x4b   :  { %532 = vmatpush.msra.mxu2 %v2089_v45  ;;  %494 = vmatpush.msra.mxu0 %v2069_v40 }
  0x4c   :  { %514 = vmatpush.msra.mxu1 %v2074_v41  ;;  %554 = vmatpush.msra.mxu3 %v2095_v47 }
  0x4d   :  { %533 = vmatpush.msra.mxu2 %v2101_v49  ;;  %495 = vmatpush.msra.mxu0 %v2079_v42 }
  0x4e   :  { %515 = vmatpush.msra.mxu1 %v2085_v44  ;;  %555 = vmatpush.msra.mxu3 %v2107_v51 }
  0x4f   :  { %534 = vmatpush.msra.mxu2 %v2113_v53  ;;  %496 = vmatpush.msra.mxu0 %v2091_v46 }
  0x50   :  { %516 = vmatpush.msra.mxu1 %v2097_v48  ;;  %556 = vmatpush.msra.mxu3 %v2119_v55 }
  0x51   :  { %535 = vmatpush.msra.mxu2 %v2125_v57  ;;  %497 = vmatpush.msra.mxu0 %v2103_v50 }
  0x52   :  { %517 = vmatpush.msra.mxu1 %v2109_v52  ;;  %557 = vmatpush.msra.mxu3 %v2131_v59 }
  0x53   :  { %536 = vmatpush.msra.mxu2 %v2137_v61  ;;  %498 = vmatpush.msra.mxu0 %v2115_v54 }
  0x54   :  { %518 = vmatpush.msra.mxu1 %v2121_v56  ;;  %558 = vmatpush.msra.mxu3 %v2143_v63 }
  0x55   :  { %348 = vmatmul.f32.vlgmr.msrb.gmra.mxu0 %v1938_v4  ;;  %537 = vmatpush.msra.mxu2 %v2149_v1 }
  0x56   :  { %368 = vmatmul.f32.vlgmr.msrb.gmra.mxu1 %v1938_v4  ;;  %388 = vmatmul.f32.vlgmr.msrb.gmra.mxu2 %v1938_v4 }
  0x57   :  { %499 = vmatpush.msra.mxu0 %v2127_v58  ;;  %408 = vmatmul.f32.vlgmr.msrb.gmra.mxu3 %v1938_v4  ;;  %v3041_v58 = vld [vmem:[#allocation30_spill] sm:$0xff]  ;;  %v3042_v4 = vld [vmem:[#allocation20_spill] sm:$0xff] }
  0x58   :  { %519 = vmatpush.msra.mxu1 %v2133_v60  ;;  %559 = vmatpush.msra.mxu3 %v2158_v5 }
  0x59   :  { %538 = vmatpush.msra.mxu2 %v2168_v9  ;;  %500 = vmatpush.msra.mxu0 %v2139_v62 }
  0x5a   :  { %520 = vmatpush.msra.mxu1 %v2145_v0  ;;  %560 = vmatpush.msra.mxu3 %v2166_v7 }
  0x5b   :  { %539 = vmatpush.msra.mxu2 %v2177_v11  ;;  %501 = vmatpush.msra.mxu0 %v2151_v3 }
  0x5c   :  { %521 = vmatpush.msra.mxu1 %v3041_v58  ;;  %561 = vmatpush.msra.mxu3 %v2174_v10 }
  0x5d   :  { %540 = vmatpush.msra.mxu2 %v2182_v38  ;;  %640 = vmatpush.msrb.mxu0 %v1980_v2 }
  0x5e   :  { %660 = vmatpush.msrb.mxu1 %v1982_v8  ;;  %700 = vmatpush.msrb.mxu3 %v1992_v14 }
  0x5f   :  { %541 = vmatpush.msra.mxu2 %v2188_v6  ;;  %641 = vmatpush.msrb.mxu0 %v1985_v12 }
  0x60   :  { %661 = vmatpush.msrb.mxu1 %v1988_v13  ;;  %701 = vmatpush.msrb.mxu3 %v2004_v18 }
  0x61   :  { %680 = vmatpush.msrb.mxu2 %v2000_v17  ;;  %642 = vmatpush.msrb.mxu0 %v1994_v15 }
  0x62   :  { %662 = vmatpush.msrb.mxu1 %v1998_v16  ;;  %702 = vmatpush.msrb.mxu3 %v2015_v22 }
  0x63   :  { %681 = vmatpush.msrb.mxu2 %v2012_v21  ;;  %643 = vmatpush.msrb.mxu0 %v2006_v19 }
  0x64   :  { %663 = vmatpush.msrb.mxu1 %v2010_v20  ;;  %703 = vmatpush.msrb.mxu3 %v2027_v26 }
  0x65   :  { %682 = vmatpush.msrb.mxu2 %v2024_v25  ;;  %644 = vmatpush.msrb.mxu0 %v2018_v23 }
  0x66   :  { %664 = vmatpush.msrb.mxu1 %v2022_v24  ;;  %704 = vmatpush.msrb.mxu3 %v2039_v30 }
  0x67   :  { %683 = vmatpush.msrb.mxu2 %v2036_v29  ;;  %645 = vmatpush.msrb.mxu0 %v2030_v27 }
  0x68   :  { %665 = vmatpush.msrb.mxu1 %v2034_v28  ;;  %705 = vmatpush.msrb.mxu3 %v2051_v34 }
  0x69   :  { %684 = vmatpush.msrb.mxu2 %v2048_v33  ;;  %646 = vmatpush.msrb.mxu0 %v2042_v31 }
  0x6a   :  { %666 = vmatpush.msrb.mxu1 %v2046_v32  ;;  %706 = vmatpush.msrb.mxu3 %v2066_v39 }
  0x6b   :  { %685 = vmatpush.msrb.mxu2 %v2060_v37  ;;  %647 = vmatpush.msrb.mxu0 %v2054_v35 }
  0x6c   :  { %667 = vmatpush.msrb.mxu1 %v2058_v36  ;;  %707 = vmatpush.msrb.mxu3 %v2083_v43 }
  0x6d   :  { %686 = vmatpush.msrb.mxu2 %v2089_v45  ;;  %648 = vmatpush.msrb.mxu0 %v2069_v40 }
  0x6e   :  { %668 = vmatpush.msrb.mxu1 %v2074_v41  ;;  %708 = vmatpush.msrb.mxu3 %v2095_v47 }
  0x6f   :  { %687 = vmatpush.msrb.mxu2 %v2101_v49  ;;  %649 = vmatpush.msrb.mxu0 %v2079_v42 }
  0x70   :  { %669 = vmatpush.msrb.mxu1 %v2085_v44  ;;  %709 = vmatpush.msrb.mxu3 %v2107_v51 }
  0x71   :  { %688 = vmatpush.msrb.mxu2 %v2113_v53  ;;  %650 = vmatpush.msrb.mxu0 %v2091_v46 }
  0x72   :  { %670 = vmatpush.msrb.mxu1 %v2097_v48  ;;  %710 = vmatpush.msrb.mxu3 %v2119_v55 }
  0x73   :  { %689 = vmatpush.msrb.mxu2 %v2125_v57  ;;  %651 = vmatpush.msrb.mxu0 %v2103_v50 }
  0x74   :  { %671 = vmatpush.msrb.mxu1 %v2109_v52  ;;  %711 = vmatpush.msrb.mxu3 %v2131_v59 }
  0x75   :  { %690 = vmatpush.msrb.mxu2 %v2137_v61  ;;  %652 = vmatpush.msrb.mxu0 %v2115_v54 }
  0x76   :  { %672 = vmatpush.msrb.mxu1 %v2121_v56  ;;  %712 = vmatpush.msrb.mxu3 %v2143_v63 }
  0x77   :  { %691 = vmatpush.msrb.mxu2 %v2149_v1  ;;  %653 = vmatpush.msrb.mxu0 %v3042_v4 }
  0x78   :  { %673 = vmatpush.msrb.mxu1 %v2133_v60  ;;  %713 = vmatpush.msrb.mxu3 %v2158_v5 }
  0x79   :  { %692 = vmatpush.msrb.mxu2 %v2168_v9  ;;  %654 = vmatpush.msrb.mxu0 %v2139_v62  ;;  %v53_v62 = vld [vmem:[%s2923_s3] sm:$0xf]  ;;  %s1939_s3 = smov [#allocation7]  }
  0x7a   :  { %674 = vmatpush.msrb.mxu1 %v2145_v0  ;;  %714 = vmatpush.msrb.mxu3 %v2166_v7  ;;  %v56_v7 = vperm.slane %v53_v62, 1  ;;  %s1575_s9 = sshll.u32 %s1939_s3, 4  ;;  %s1576_s9 = int_to_ptr.vmem [resolvable:$true] %s1575_s9 }
  0x7b   :  { %693 = vmatpush.msrb.mxu2 %v2177_v11  ;;  %655 = vmatpush.msrb.mxu0 %v2151_v3  ;;  %v55_v11 = vperm.slane %v53_v62, 0 }
  0x7c   :  { %675 = vmatpush.msrb.mxu1 %v3041_v58  ;;  %715 = vmatpush.msrb.mxu3 %v2174_v10  ;;  %v2336_v10 = vperm.slane %v53_v62, 2 }
  0x7d   :  { %694 = vmatpush.msrb.mxu2 %v2182_v38 }
  0x7f   :  { %695 = vmatpush.msrb.mxu2 %v2188_v6  ;;  %v2338_v6 = vperm.slane %v53_v62, 3 }
  0x91   :  { %v120_v60 = vpop.f32.mrf.mxu0  ;;  %v149_v5 = vpop.f32.mrf.mxu1 }
  0x99   :  { %v2328_v0 = vpop.f32.mrf.mxu2  ;;  %v2330_v4 = vpop.f32.mrf.mxu3 }
  0x9a   :  { %v122_v3 = vpop.f32.mrf.mxu0  ;;  %v151_v58 = vpop.f32.mrf.mxu1 }
  0x9b   :  { %v2332_v38 = vadd.f32 %v122_v3, %v55_v11  ;;  %v2334_v63 = vadd.f32 %v151_v58, %v56_v7 }
  0x9d   :  { %3043 = vst [vmem:[#allocation37_spill] sm:$0xff] %v2332_v38 }
  0x9e   :  { %3044 = vst [vmem:[#allocation38_spill] sm:$0xff] %v2334_v63 }
  0xa1   :  { %v180_v9 = vpop.f32.mrf.mxu2  ;;  %v209_v54 = vpop.f32.mrf.mxu3 }
  0xa2   :  { %v2341_v56 = vadd.f32 %v180_v9, %v2336_v10  ;;  %v125_v59 = vpop.f32.mrf.mxu0  ;;  %v2344_v1 = vadd.f32 %v209_v54, %v2338_v6  ;;  %v154_v3 = vpop.f32.mrf.mxu1 }
  0xa3   :  { %v2346_v52 = vadd.f32 %v125_v59, %v55_v11  ;;  %v2348_v38 = vadd.f32 %v154_v3, %v56_v7 }
  0xa4   :  { %3045 = vst [vmem:[#allocation39_spill] sm:$0xff] %v2341_v56 }
  0xa5   :  { %3046 = vst [vmem:[#allocation40_spill] sm:$0xff] %v2344_v1 }
  0xa6   :  { %3047 = vst [vmem:[#allocation41_spill] sm:$0xff] %v2346_v52 }
  0xa7   :  { %3048 = vst [vmem:[#allocation42_spill] sm:$0xff] %v2348_v38 }
  0xa9   :  { %v183_v58 = vpop.f32.mrf.mxu2 }
  0xaa   :  { %v2351_v63 = vadd.f32 %v183_v58, %v2336_v10  ;;  %v212_v62 = vpop.f32.mrf.mxu3  ;;  %v127_v50 = vpop.f32.mrf.mxu0 }
  0xab   :  { %v2354_v55 = vadd.f32 %v212_v62, %v2338_v6  ;;  %v2356_v9 = vadd.f32 %v127_v50, %v55_v11  ;;  %v156_v56 = vpop.f32.mrf.mxu1 }
  0xac   :  { %3049 = vst [vmem:[#allocation43_spill] sm:$0xff] %v2351_v63  ;;  %v2358_v61 = vadd.f32 %v156_v56, %v56_v7 }
  0xad   :  { %3050 = vst [vmem:[#allocation44_spill] sm:$0xff] %v2354_v55 }
  0xae   :  { %3051 = vst [vmem:[#allocation45_spill] sm:$0xff] %v2356_v9 }
  0xaf   :  { %3052 = vst [vmem:[#allocation46_spill] sm:$0xff] %v2358_v61 }
  0xb1   :  { %v185_v54 = vpop.f32.mrf.mxu2 }
  0xb2   :  { %v2361_v59 = vadd.f32 %v185_v54, %v2336_v10  ;;  %v214_v3 = vpop.f32.mrf.mxu3  ;;  %v130_v38 = vpop.f32.mrf.mxu0 }
  0xb3   :  { %v2364_v52 = vadd.f32 %v214_v3, %v2338_v6  ;;  %v2366_v58 = vadd.f32 %v130_v38, %v55_v11  ;;  %v159_v63 = vpop.f32.mrf.mxu1 }
  0xb4   :  { %3053 = vst [vmem:[#allocation47_spill] sm:$0xff] %v2361_v59  ;;  %v2368_v1 = vadd.f32 %v159_v63, %v56_v7 }
  0xb5   :  { %3054 = vst [vmem:[#allocation48_spill] sm:$0xff] %v2364_v52 }
  0xb6   :  { %3055 = vst [vmem:[#allocation49_spill] sm:$0xff] %v2366_v58 }
  0xb7   :  { %3056 = vst [vmem:[#allocation50_spill] sm:$0xff] %v2368_v1 }
  0xb9   :  { %v188_v62 = vpop.f32.mrf.mxu2 }
  0xba   :  { %v2371_v50 = vadd.f32 %v188_v62, %v2336_v10  ;;  %v217_v56 = vpop.f32.mrf.mxu3  ;;  %v132_v61 = vpop.f32.mrf.mxu0 }
  0xbb   :  { %v2374_v9 = vadd.f32 %v217_v56, %v2338_v6  ;;  %v2376_v54 = vadd.f32 %v132_v61, %v55_v11  ;;  %v161_v59 = vpop.f32.mrf.mxu1 }
  0xbc   :  { %3057 = vst [vmem:[#allocation51_spill] sm:$0xff] %v2371_v50  ;;  %v2378_v55 = vadd.f32 %v161_v59, %v56_v7 }
  0xbd   :  { %3058 = vst [vmem:[#allocation52_spill] sm:$0xff] %v2374_v9 }
  0xbe   :  { %3059 = vst [vmem:[#allocation53_spill] sm:$0xff] %v2376_v54 }
  0xbf   :  { %3060 = vst [vmem:[#allocation54_spill] sm:$0xff] %v2378_v55 }
  0xc1   :  { %v190_v3 = vpop.f32.mrf.mxu2 }
  0xc2   :  { %v2381_v38 = vadd.f32 %v190_v3, %v2336_v10  ;;  %v219_v63 = vpop.f32.mrf.mxu3  ;;  %v135_v1 = vpop.f32.mrf.mxu0 }
  0xc3   :  { %v2384_v58 = vadd.f32 %v219_v63, %v2338_v6  ;;  %v2386_v62 = vadd.f32 %v135_v1, %v55_v11  ;;  %v164_v50 = vpop.f32.mrf.mxu1  ;;  %v121_v63 = vadd.f32 %v120_v60, %v55_v11  ;;  %v208_v60 = vadd.f32 %v2330_v4, %v2338_v6 }
  0xc4   :  { %3061 = vst [vmem:[#allocation55_spill] sm:$0xff] %v2381_v38  ;;  %v2388_v52 = vadd.f32 %v164_v50, %v56_v7 }
  0xc5   :  { %3062 = vst [vmem:[#allocation56_spill] sm:$0xff] %v2384_v58 }
  0xc6   :  { %3063 = vst [vmem:[#allocation57_spill] sm:$0xff] %v2386_v62  ;;  %v150_v62 = vadd.f32 %v149_v5, %v56_v7 }
  0xc7   :  { %3064 = vst [vmem:[#allocation58_spill] sm:$0xff] %v2388_v52 }
  0xc9   :  { %v193_v56 = vpop.f32.mrf.mxu2 }
  0xca   :  { %v2391_v61 = vadd.f32 %v193_v56, %v2336_v10  ;;  %v222_v59 = vpop.f32.mrf.mxu3  ;;  %v137_v55 = vpop.f32.mrf.mxu0 }
  0xcb   :  { %v2394_v54 = vadd.f32 %v222_v59, %v2338_v6  ;;  %v2396_v3 = vadd.f32 %v137_v55, %v55_v11  ;;  %v166_v38 = vpop.f32.mrf.mxu1 }
  0xcc   :  { %3065 = vst [vmem:[#allocation59_spill] sm:$0xff] %v2391_v61  ;;  %v2398_v9 = vadd.f32 %v166_v38, %v56_v7 }
  0xcd   :  { %3066 = vst [vmem:[#allocation60_spill] sm:$0xff] %v2394_v54 }
  0xce   :  { %3067 = vst [vmem:[#allocation61_spill] sm:$0xff] %v2396_v3 }
  0xcf   :  { %3068 = vst [vmem:[#allocation62_spill] sm:$0xff] %v2398_v9 }
  0xd1   :  { %v195_v1 = vpop.f32.mrf.mxu2 }
  0xd2   :  { %v2401_v50 = vadd.f32 %v195_v1, %v2336_v10  ;;  %v224_v52 = vpop.f32.mrf.mxu3  ;;  %v349_v58 = vpop.f32.mrf.mxu0 }
  0xd3   :  { %v2404_v56 = vadd.f32 %v224_v52, %v2338_v6  ;;  %v412_v61 = vadd.f32 %v349_v58, %v121_v63  ;;  %v369_v48 = vpop.f32.mrf.mxu1 }
  0xd4   :  { %3069 = vst [vmem:[#allocation63_spill] sm:$0xff] %v2401_v50  ;;  %v413_v59 = vadd.f32 %v369_v48, %v150_v62  ;;  %v179_v48 = vadd.f32 %v2328_v0, %v2336_v10 }
  0xd5   :  { %3070 = vst [vmem:[#allocation64_spill] sm:$0xff] %v2404_v56  ;;  %v1631_v54 = vmul.f32 -1.442695, %v412_v61 }
  0xd6   :  { %v1632_v55 = vmul.f32 -1.442695, %v413_v59 }
  0xd7   :  { %1665 = vpow2.f32 %v1631_v54 }
  0xd8   :  { %1667 = vpow2.f32 %v1632_v55 }
  0xd9   :  { %v389_v52 = vpop.f32.mrf.mxu2 }
  0xda   :  { %v409_v11 = vpop.f32.mrf.mxu3  ;;  %v414_v62 = vadd.f32 %v389_v52, %v179_v48 }
  0xdb   :  { %v415_v5 = vadd.f32 %v409_v11, %v208_v60 }
  0xdd   :  { %v1666_v7 = vpop.eup %1665  ;;  %v1633_v38 = vmul.f32 -1.442695, %v415_v5 }
  0xde   :  { %v1668_v1 = vpop.eup %1667  ;;  %v419_v50 = vadd.f32 1.0, %v1666_v7 }
  0xdf   :  { %v438_v9 = vadd.f32 1.0, %v1668_v1  ;;  %1669 = vpow2.f32 %v1633_v38 }
  0xe0   :  { %1671 = vrcp.f32 %v419_v50  ;;  %v431_v60 = vand.u32 2147483648, %v419_v50  ;;  %v429_v7 = vand.u32 2147483647, %v419_v50  ;;  %vm425_vm4 = vweird.f32 %v419_v50 }
  0xe1   :  { %1673 = vrcp.f32 %v438_v9  ;;  %v450_v11 = vand.u32 2147483648, %v438_v9  ;;  %v448_v1 = vand.u32 2147483647, %v438_v9  ;;  %vm444_vm5 = vweird.f32 %v438_v9 }
  0xe2   :  { %v432_v52 = vor.u32 1.1754944e-38, %v431_v60  ;;  %vm430_vm8 = vcmp.eq.f32.partialorder %v429_v7, 8.507059e+37 }
  0xe3   :  { %vm449_vm9 = vcmp.eq.f32.partialorder %v448_v1, 8.507059e+37 }
  0xe5   :  { %v1670_v58 = vpop.eup %1669 }
  0xe6   :  { %v1672_v54 = vpop.eup %1671  ;;  %v458_v61 = vadd.f32 1.0, %v1670_v58  ;;  %v451_v58 = vor.u32 1.1754944e-38, %v450_v11 }
  0xe7   :  { %v1674_v63 = vpop.eup %1673  ;;  %v421_v6 = vmul.f32 %v1672_v54, %v419_v50  ;;  %vm426_vm2 = vweird.f32 %v1672_v54 }
  0xe8   :  { %v440_v4 = vmul.f32 %v1674_v63, %v438_v9  ;;  %1675 = vrcp.f32 %v458_v61  ;;  %vm445_vm3 = vweird.f32 %v1674_v63  ;;  %vm427_vm6 = vmor %vm425_vm4, %vm426_vm2  ;;  %v470_v60 = vand.u32 2147483648, %v458_v61 }
  0xe9   :  { %v422_v59 = vsub.f32 1.0, %v421_v6  ;;  %1677 = vtanh.f32 %v414_v62  ;;  %vm446_vm7 = vmor %vm444_vm5, %vm445_vm3  ;;  %vm464_vm11 = vweird.f32 %v458_v61 }
  0xea   :  { %v441_v55 = vsub.f32 1.0, %v440_v4  ;;  %v471_v7 = vor.u32 1.1754944e-38, %v470_v60 }
  0xeb   :  { %v423_v5 = vmul.f32 %v1672_v54, %v422_v59 }
  0xec   :  { %v442_v38 = vmul.f32 %v1674_v63, %v441_v55 }
  0xed   :  { %v424_v0 = vadd.f32 %v1672_v54, %v423_v5 }
  0xee   :  { %v1676_v10 = vpop.eup %1675  ;;  %v443_v48 = vadd.f32 %v1674_v63, %v442_v38 }
  0xef   :  { %v428_v6 = vsel %vm427_vm6, %v1672_v54, %v424_v0  ;;  %v460_v4 = vmul.f32 %v1676_v10, %v458_v61  ;;  %v1678_v62 = vpop.eup %1677  ;;  %vm465_vm10 = vweird.f32 %v1676_v10  ;;  %v468_v54 = vand.u32 2147483647, %v458_v61 }
  0xf0   :  { %v433_v56 = vsel %vm430_vm8, %v432_v52, %v428_v6  ;;  %v447_v59 = vsel %vm446_vm7, %v1674_v63, %v443_v48  ;;  %vm466_vm12 = vmor %vm464_vm11, %vm465_vm10  ;;  %v3099_v52 = vld [vmem:[#allocation39_spill] sm:$0xff] }
  0xf1   :  { %v452_v3 = vsel %vm449_vm9, %v451_v58, %v447_v59  ;;  %v475_v55 = vmul.f32 %v1678_v62, %v433_v56  ;;  %v461_v46 = vsub.f32 1.0, %v460_v4  ;;  %vm469_vm13 = vcmp.eq.f32.partialorder %v468_v54, 8.507059e+37 }
  0xf2   :  { %v474_v51 = vmul.f32 0.0, %v452_v3 }
  0xf3   :  { %v462_v5 = vmul.f32 %v1676_v10, %v461_v46 }
  0xf4   :  { %v2410_v50 = vadd.f32 %v475_v55, %v474_v51 }
  0xf5   :  { %v463_v9 = vadd.f32 %v1676_v10, %v462_v5 }
  0xf6   :  { %1679 = vtanh.f32 %v2410_v50 }
  0xf7   :  { %v467_v11 = vsel %vm466_vm12, %v1676_v10, %v463_v9 }
  0xf8   :  { %v472_v38 = vsel %vm469_vm13, %v471_v7, %v467_v11 }
  0xfc   :  { %v1680_v63 = vpop.eup %1679 }
  0xfd   :  { %v478_v1 = vmul.f32 %v1680_v63, %v472_v38 }
  0xff   :  { %502 = vmatmul.f32.vlgmr.msra.gmra.mxu0 %v478_v1  ;;  %522 = vmatmul.f32.vlgmr.msra.gmra.mxu1 %v478_v1 }
 0x100   :  { %542 = vmatmul.f32.vlgmr.msra.gmra.mxu2 %v478_v1  ;;  %562 = vmatmul.f32.vlgmr.msra.gmra.mxu3 %v478_v1 }
 0x101   :  { %794 = vmatpush.msra.mxu0 %v1980_v2  ;;  %814 = vmatpush.msra.mxu1 %v1982_v8  ;;  %v3071_v2 = vld [vmem:[#allocation15_spill] sm:$0xff]  ;;  %v3072_v8 = vld [vmem:[#allocation12_spill] sm:$0xff] }
 0x102   :  { %834 = vmatpush.msra.mxu2 %v2000_v17  ;;  %854 = vmatpush.msra.mxu3 %v1992_v14  ;;  %v3075_v14 = vld [vmem:[#allocation18_spill] sm:$0xff]  ;;  %v3078_v17 = vld [vmem:[#allocation27_spill] sm:$0xff] }
 0x103   :  { %795 = vmatpush.msra.mxu0 %v1985_v12  ;;  %815 = vmatpush.msra.mxu1 %v1988_v13  ;;  %v3073_v12 = vld [vmem:[#allocation13_spill] sm:$0xff]  ;;  %v3074_v13 = vld [vmem:[#allocation23_spill] sm:$0xff] }
 0x104   :  { %835 = vmatpush.msra.mxu2 %v2012_v21  ;;  %855 = vmatpush.msra.mxu3 %v2004_v18  ;;  %v3079_v18 = vld [vmem:[#allocation21_spill] sm:$0xff]  ;;  %v3082_v21 = vld [vmem:[#allocation32_spill] sm:$0xff] }
 0x105   :  { %796 = vmatpush.msra.mxu0 %v1994_v15  ;;  %816 = vmatpush.msra.mxu1 %v1998_v16  ;;  %v3076_v15 = vld [vmem:[#allocation14_spill] sm:$0xff]  ;;  %v3077_v16 = vld [vmem:[#allocation16_spill] sm:$0xff] }
 0x106   :  { %836 = vmatpush.msra.mxu2 %v2024_v25  ;;  %856 = vmatpush.msra.mxu3 %v2015_v22  ;;  %v3083_v22 = vld [vmem:[#allocation25_spill] sm:$0xff]  ;;  %v3086_v25 = vld [vmem:[#allocation34_spill] sm:$0xff] }
 0x107   :  { %797 = vmatpush.msra.mxu0 %v2006_v19  ;;  %817 = vmatpush.msra.mxu1 %v2010_v20  ;;  %v3080_v19 = vld [vmem:[#allocation17_spill] sm:$0xff]  ;;  %v3081_v20 = vld [vmem:[#allocation19_spill] sm:$0xff] }
 0x108   :  { %837 = vmatpush.msra.mxu2 %v2036_v29  ;;  %857 = vmatpush.msra.mxu3 %v2027_v26  ;;  %v3087_v26 = vld [vmem:[#allocation29_spill] sm:$0xff]  ;;  %v3090_v29 = vld [vmem:[#allocation35_spill] sm:$0xff] }
 0x109   :  { %798 = vmatpush.msra.mxu0 %v2018_v23  ;;  %818 = vmatpush.msra.mxu1 %v2022_v24  ;;  %v3084_v23 = vld [vmem:[#allocation20_spill] sm:$0xff]  ;;  %v3085_v24 = vld [vmem:[#allocation22_spill] sm:$0xff] }
 0x10a   :  { %838 = vmatpush.msra.mxu2 %v2048_v33  ;;  %858 = vmatpush.msra.mxu3 %v2039_v30  ;;  %v3091_v30 = vld [vmem:[#allocation31_spill] sm:$0xff]  ;;  %v3094_v33 = vld [vmem:[#allocation36_spill] sm:$0xff] }
 0x10b   :  { %799 = vmatpush.msra.mxu0 %v2030_v27  ;;  %819 = vmatpush.msra.mxu1 %v2034_v28  ;;  %v3088_v27 = vld [vmem:[#allocation24_spill] sm:$0xff]  ;;  %v3089_v28 = vld [vmem:[#allocation26_spill] sm:$0xff] }
 0x10c   :  { %839 = vmatpush.msra.mxu2 %v2060_v37  ;;  %859 = vmatpush.msra.mxu3 %v2051_v34  ;;  %v3095_v34 = vld [vmem:[#allocation33_spill] sm:$0xff] }
 0x10d   :  { %800 = vmatpush.msra.mxu0 %v2042_v31  ;;  %820 = vmatpush.msra.mxu1 %v2046_v32  ;;  %v3092_v31 = vld [vmem:[#allocation28_spill] sm:$0xff]  ;;  %v3093_v32 = vld [vmem:[#allocation30_spill] sm:$0xff]  ;;  %v3096_v37 = vld [vmem:[#allocation37_spill] sm:$0xff] }
 0x10e   :  { %840 = vmatpush.msra.mxu2 %v2089_v45  ;;  %860 = vmatpush.msra.mxu3 %v2066_v39  ;;  %v3098_v45 = vld [vmem:[#allocation40_spill] sm:$0xff] }
 0x10f   :  { %801 = vmatpush.msra.mxu0 %v2054_v35  ;;  %821 = vmatpush.msra.mxu1 %v2058_v36 }
 0x110   :  { %841 = vmatpush.msra.mxu2 %v2101_v49  ;;  %861 = vmatpush.msra.mxu3 %v2083_v43 }
 0x111   :  { %802 = vmatpush.msra.mxu0 %v2069_v40  ;;  %822 = vmatpush.msra.mxu1 %v2074_v41  ;;  %v3097_v40 = vld [vmem:[#allocation38_spill] sm:$0xff] }
 0x112   :  { %842 = vmatpush.msra.mxu2 %v2113_v53  ;;  %862 = vmatpush.msra.mxu3 %v2095_v47 }
 0x113   :  { %803 = vmatpush.msra.mxu0 %v2079_v42  ;;  %823 = vmatpush.msra.mxu1 %v2085_v44 }
 0x114   :  { %843 = vmatpush.msra.mxu2 %v2125_v57  ;;  %863 = vmatpush.msra.mxu3 %v3071_v2 }
 0x115   :  { %804 = vmatpush.msra.mxu0 %v3072_v8  ;;  %824 = vmatpush.msra.mxu1 %v3073_v12 }
 0x116   :  { %844 = vmatpush.msra.mxu2 %v3074_v13  ;;  %864 = vmatpush.msra.mxu3 %v3075_v14 }
 0x117   :  { %805 = vmatpush.msra.mxu0 %v3076_v15  ;;  %825 = vmatpush.msra.mxu1 %v3077_v16 }
 0x118   :  { %845 = vmatpush.msra.mxu2 %v3078_v17  ;;  %865 = vmatpush.msra.mxu3 %v3079_v18 }
 0x119   :  { %806 = vmatpush.msra.mxu0 %v3080_v19  ;;  %826 = vmatpush.msra.mxu1 %v3081_v20 }
 0x11a   :  { %846 = vmatpush.msra.mxu2 %v3082_v21  ;;  %866 = vmatpush.msra.mxu3 %v3083_v22 }
 0x11b   :  { %807 = vmatpush.msra.mxu0 %v3084_v23  ;;  %827 = vmatpush.msra.mxu1 %v3085_v24 }
 0x11c   :  { %847 = vmatpush.msra.mxu2 %v3086_v25  ;;  %867 = vmatpush.msra.mxu3 %v3087_v26 }
 0x11d   :  { %808 = vmatpush.msra.mxu0 %v3088_v27  ;;  %828 = vmatpush.msra.mxu1 %v3089_v28 }
 0x11e   :  { %848 = vmatpush.msra.mxu2 %v3090_v29  ;;  %868 = vmatpush.msra.mxu3 %v3091_v30 }
 0x11f   :  { %809 = vmatpush.msra.mxu0 %v3092_v31  ;;  %829 = vmatpush.msra.mxu1 %v3093_v32 }
 0x120   :  { %849 = vmatpush.msra.mxu2 %v3094_v33  ;;  %869 = vmatpush.msra.mxu3 %v3095_v34 }
 0x17c   :  { %v503_v35 = vpop.f32.mrf.mxu0  ;;  %v523_v36 = vpop.f32.mrf.mxu1 }
 0x17d   :  { %v566_v39 = vadd.f32 %v503_v35, %v3096_v37  ;;  %v567_v41 = vadd.f32 %v523_v36, %v3097_v40 }
 0x17f   :  { %v1634_v42 = vmul.f32 -1.442695, %v566_v39  ;;  %v1635_v43 = vmul.f32 -1.442695, %v567_v41 }
 0x181   :  { %1681 = vpow2.f32 %v1634_v42  ;;  %v2488_v42 = vld [vmem:[#allocation3 + $0x1e8] sm:$0xff] }
 0x182   :  { %1683 = vpow2.f32 %v1635_v43  ;;  %v2491_v43 = vld [vmem:[#allocation3 + $0x1f0] sm:$0xff] }
 0x183   :  { %v563_v44 = vpop.f32.mrf.mxu3  ;;  %v543_v56 = vpop.f32.mrf.mxu2 }
 0x184   :  { %v569_v46 = vadd.f32 %v563_v44, %v3098_v45  ;;  %v568_v48 = vadd.f32 %v543_v56, %v3099_v52  ;;  %v2494_v44 = vld [vmem:[#allocation3 + $0x1f8] sm:$0xff]  ;;  %v2497_v45 = vld [vmem:[#allocation3 + $0x1c0] sm:$0xff] }
 0x185   :  { %v2518_v56 = vld [vmem:[#allocation3 + $0x1b8] sm:$0xff] }
 0x186   :  { %v1636_v47 = vmul.f32 -1.442695, %v569_v46  ;;  %v2500_v46 = vld [vmem:[#allocation3 + $0x1c8] sm:$0xff]  ;;  %v2530_v52 = vld [vmem:[#allocation3 + $0x198] sm:$0xff] }
 0x187   :  { %v1682_v49 = vpop.eup %1681 }
 0x188   :  { %v1684_v51 = vpop.eup %1683  ;;  %v573_v53 = vadd.f32 1.0, %v1682_v49  ;;  %1685 = vpow2.f32 %v1636_v47  ;;  %v2503_v47 = vld [vmem:[#allocation3 + $0x1d0] sm:$0xff]  ;;  %v2506_v49 = vld [vmem:[#allocation3 + $0x1d8] sm:$0xff] }
 0x189   :  { %v592_v3 = vadd.f32 1.0, %v1684_v51  ;;  %v2509_v51 = vld [vmem:[#allocation3 + $0x1a0] sm:$0xff] }
 0x18a   :  { %1687 = vrcp.f32 %v573_v53  ;;  %v585_v55 = vand.u32 2147483648, %v573_v53  ;;  %v583_v60 = vand.u32 2147483647, %v573_v53  ;;  %vm579_vm0 = vweird.f32 %v573_v53 }
 0x18b   :  { %1689 = vrcp.f32 %v592_v3  ;;  %v604_v5 = vand.u32 2147483648, %v592_v3  ;;  %v602_v11 = vand.u32 2147483647, %v592_v3  ;;  %vm598_vm1 = vweird.f32 %v592_v3 }
 0x18c   :  { %v586_v38 = vor.u32 1.1754944e-38, %v585_v55  ;;  %vm584_vm4 = vcmp.eq.f32.partialorder %v583_v60, 8.507059e+37  ;;  %v2551_v55 = vld [vmem:[#allocation3 + $0x150] sm:$0xff]  ;;  %v2560_v60 = vld [vmem:[#allocation3 + $0x128] sm:$0xff] }
 0x18d   :  { %v605_v8 = vor.u32 1.1754944e-38, %v604_v5  ;;  %vm603_vm5 = vcmp.eq.f32.partialorder %v602_v11, 8.507059e+37  ;;  %v2554_v5 = vld [vmem:[#allocation3 + $0x158] sm:$0xff] }
 0x18e   :  { %v1686_v61 = vpop.eup %1685  ;;  %v2566_v11 = vld [vmem:[#allocation3 + $0x138] sm:$0xff] }
 0x18f   :  { %v612_v0 = vadd.f32 1.0, %v1686_v61  ;;  %v2521_v61 = vld [vmem:[#allocation3 + $0x180] sm:$0xff] }
 0x190   :  { %v1688_v10 = vpop.eup %1687 }
 0x191   :  { %v1690_v58 = vpop.eup %1689  ;;  %v575_v6 = vmul.f32 %v1688_v10, %v573_v53  ;;  %1691 = vrcp.f32 %v612_v0  ;;  %vm580_vm14 = vweird.f32 %v1688_v10  ;;  %v624_v31 = vand.u32 2147483648, %v612_v0  ;;  %v2512_v53 = vld [vmem:[#allocation3 + $0x1a8] sm:$0xff] }
 0x192   :  { %v594_v4 = vmul.f32 %v1690_v58, %v592_v3  ;;  %1693 = vtanh.f32 %v568_v48  ;;  %vm599_vm15 = vweird.f32 %v1690_v58  ;;  %vm581_vm2 = vmor %vm579_vm0, %vm580_vm14  ;;  %vm618_vm7 = vweird.f32 %v612_v0  ;;  %v2515_v3 = vld [vmem:[#allocation3 + $0x1b0] sm:$0xff]  ;;  %v2533_v48 = vld [vmem:[#allocation3 + $0x160] sm:$0xff] }
 0x193   :  { %v576_v62 = vsub.f32 1.0, %v575_v6  ;;  %vm600_vm3 = vmor %vm598_vm1, %vm599_vm15  ;;  %v622_v35 = vand.u32 2147483647, %v612_v0  ;;  %v625_v37 = vor.u32 1.1754944e-38, %v624_v31  ;;  %v2539_v6 = vld [vmem:[#allocation3 + $0x170] sm:$0xff]  ;;  %v2623_v31 = vld [vmem:[#allocation3 + $0x60] sm:$0xff] }
 0x194   :  { %v595_v59 = vsub.f32 1.0, %v594_v4  ;;  %v2542_v4 = vld [vmem:[#allocation3 + $0x178] sm:$0xff]  ;;  %3107 = vst [vmem:[#allocation27_spill] sm:$0xff] %v2623_v31 }
 0x195   :  { %v577_v9 = vmul.f32 %v1688_v10, %v576_v62  ;;  %vm623_vm9 = vcmp.eq.f32.partialorder %v622_v35, 8.507059e+37  ;;  %v2545_v62 = vld [vmem:[#allocation3 + $0x140] sm:$0xff] }
 0x196   :  { %v596_v54 = vmul.f32 %v1690_v58, %v595_v59  ;;  %v2548_v59 = vld [vmem:[#allocation3 + $0x148] sm:$0xff]  ;;  %v2631_v35 = vld [vmem:[#allocation3 + $0x40] sm:$0xff] }
 0x197   :  { %v1692_v7 = vpop.eup %1691  ;;  %v578_v63 = vadd.f32 %v1688_v10, %v577_v9  ;;  %v2557_v9 = vld [vmem:[#allocation3 + $0x120] sm:$0xff]  ;;  %3109 = vst [vmem:[#allocation17_spill] sm:$0xff] %v2631_v35 }
 0x198   :  { %v597_v1 = vadd.f32 %v1690_v58, %v596_v54  ;;  %v614_v2 = vmul.f32 %v1692_v7, %v612_v0  ;;  %v1694_v14 = vpop.eup %1693  ;;  %vm619_vm6 = vweird.f32 %v1692_v7  ;;  %v2524_v0 = vld [vmem:[#allocation3 + $0x188] sm:$0xff]  ;;  %v2563_v54 = vld [vmem:[#allocation3 + $0x130] sm:$0xff] }
 0x199   :  { %v582_v12 = vsel %vm581_vm2, %v1688_v10, %v578_v63  ;;  %vm620_vm8 = vmor %vm618_vm7, %vm619_vm6  ;;  %v2527_v10 = vld [vmem:[#allocation3 + $0x190] sm:$0xff]  ;;  %v2572_v63 = vld [vmem:[#allocation3 + $0x108] sm:$0xff] }
 0x19a   :  { %v587_v15 = vsel %vm584_vm4, %v586_v38, %v582_v12  ;;  %v601_v16 = vsel %vm600_vm3, %v1690_v58, %v597_v1  ;;  %v615_v18 = vsub.f32 1.0, %v614_v2  ;;  %v2536_v58 = vld [vmem:[#allocation3 + $0x168] sm:$0xff]  ;;  %v2575_v38 = vld [vmem:[#allocation3 + $0x110] sm:$0xff]  ;;  %v2578_v1 = vld [vmem:[#allocation3 + $0x118] sm:$0xff] }
 0x19b   :  { %v606_v19 = vsel %vm603_vm5, %v605_v8, %v601_v16  ;;  %v629_v20 = vmul.f32 %v1694_v14, %v587_v15  ;;  %v2581_v2 = vld [vmem:[#allocation3 + $0xe0] sm:$0xff]  ;;  %v2584_v8 = vld [vmem:[#allocation3 + $0xe8] sm:$0xff]  ;;  %v2587_v12 = vld [vmem:[#allocation3 + $0xf0] sm:$0xff] }
 0x19c   :  { %v628_v23 = vmul.f32 %v606_v19, %v2410_v50  ;;  %v616_v24 = vmul.f32 %v1692_v7, %v615_v18  ;;  %v2485_v50 = vld [vmem:[#allocation3 + $0x1e0] sm:$0xff]  ;;  %v2590_v14 = vld [vmem:[#allocation3 + $0xf8] sm:$0xff]  ;;  %v2596_v16 = vld [vmem:[#allocation3 + $0xc8] sm:$0xff] }
 0x19d   :  { %v2593_v15 = vld [vmem:[#allocation3 + $0xc0] sm:$0xff]  ;;  %v2600_v18 = vld [vmem:[#allocation3 + $0xd8] sm:$0xff] }
 0x19e   :  { %v2482_v27 = vadd.f32 %v629_v20, %v628_v23  ;;  %v617_v28 = vadd.f32 %v1692_v7, %v616_v24  ;;  %3100 = vst [vmem:[#allocation15_spill] sm:$0xff] %v2600_v18  ;;  %v2603_v19 = vld [vmem:[#allocation3 + $0xa0] sm:$0xff]  ;;  %v2606_v20 = vld [vmem:[#allocation3 + $0xa8] sm:$0xff]  ;;  %v2610_v23 = vld [vmem:[#allocation3 + $0xb8] sm:$0xff] }
 0x19f   :  { %3101 = vst [vmem:[#allocation12_spill] sm:$0xff] %v2603_v19  ;;  %v2613_v24 = vld [vmem:[#allocation3 + $0x80] sm:$0xff] }
 0x1a0   :  { %1695 = vtanh.f32 %v2482_v27  ;;  %v621_v36 = vsel %vm620_vm8, %v1692_v7, %v617_v28  ;;  %v2569_v7 = vld [vmem:[#allocation3 + $0x100] sm:$0xff]  ;;  %3102 = vst [vmem:[#allocation13_spill] sm:$0xff] %v2606_v20  ;;  %v2620_v28 = vld [vmem:[#allocation3 + $0x98] sm:$0xff] }
 0x1a1   :  { %v626_v40 = vsel %vm623_vm9, %v625_v37, %v621_v36  ;;  %3103 = vst [vmem:[#allocation23_spill] sm:$0xff] %v2610_v23  ;;  %v2639_v36 = vld [vmem:[#allocation3 + $0x20] sm:$0xff]  ;;  %v2642_v37 = vld [vmem:[#allocation3 + $0x28] sm:$0xff] }
 0x1a2   :  { %3104 = vst [vmem:[#allocation18_spill] sm:$0xff] %v2613_v24 }
 0x1a3   :  { %3106 = vst [vmem:[#allocation16_spill] sm:$0xff] %v2620_v28 }
 0x1a4   :  { %3111 = vst [vmem:[#allocation32_spill] sm:$0xff] %v2639_v36 }
 0x1a5   :  { %3112 = vst [vmem:[#allocation25_spill] sm:$0xff] %v2642_v37 }
 0x1a6   :  { %v1696_v39 = vpop.eup %1695 }
 0x1a7   :  { %v632_v41 = vmul.f32 %v1696_v39, %v626_v40  ;;  %v3115_v40 = vld [vmem:[#allocation42_spill] sm:$0xff] }
 0x1a9   :  { %656 = vmatmul.f32.vlgmr.msrb.gmra.mxu0 %v632_v41  ;;  %676 = vmatmul.f32.vlgmr.msrb.gmra.mxu1 %v632_v41 }
 0x1aa   :  { %696 = vmatmul.f32.vlgmr.msrb.gmra.mxu2 %v632_v41  ;;  %716 = vmatmul.f32.vlgmr.msrb.gmra.mxu3 %v632_v41 }
 0x1ab   :  { %948 = vmatpush.msrb.mxu0 %v2485_v50  ;;  %968 = vmatpush.msrb.mxu1 %v2488_v42 }
 0x1ac   :  { %988 = vmatpush.msrb.mxu2 %v2491_v43  ;;  %1008 = vmatpush.msrb.mxu3 %v2494_v44 }
 0x1ad   :  { %949 = vmatpush.msrb.mxu0 %v2497_v45  ;;  %969 = vmatpush.msrb.mxu1 %v2500_v46 }
 0x1ae   :  { %989 = vmatpush.msrb.mxu2 %v2503_v47  ;;  %1009 = vmatpush.msrb.mxu3 %v2506_v49 }
 0x1af   :  { %950 = vmatpush.msrb.mxu0 %v2509_v51  ;;  %970 = vmatpush.msrb.mxu1 %v2512_v53 }
 0x1b0   :  { %990 = vmatpush.msrb.mxu2 %v2515_v3  ;;  %1010 = vmatpush.msrb.mxu3 %v2518_v56 }
 0x1b1   :  { %951 = vmatpush.msrb.mxu0 %v2521_v61  ;;  %971 = vmatpush.msrb.mxu1 %v2524_v0 }
 0x1b2   :  { %991 = vmatpush.msrb.mxu2 %v2527_v10  ;;  %1011 = vmatpush.msrb.mxu3 %v2530_v52 }
 0x1b3   :  { %952 = vmatpush.msrb.mxu0 %v2533_v48  ;;  %972 = vmatpush.msrb.mxu1 %v2536_v58 }
 0x1b4   :  { %992 = vmatpush.msrb.mxu2 %v2539_v6  ;;  %1012 = vmatpush.msrb.mxu3 %v2542_v4 }
 0x1b5   :  { %953 = vmatpush.msrb.mxu0 %v2545_v62  ;;  %973 = vmatpush.msrb.mxu1 %v2548_v59 }
 0x1b6   :  { %993 = vmatpush.msrb.mxu2 %v2551_v55  ;;  %1013 = vmatpush.msrb.mxu3 %v2554_v5 }
 0x1b7   :  { %954 = vmatpush.msrb.mxu0 %v2557_v9  ;;  %974 = vmatpush.msrb.mxu1 %v2560_v60 }
 0x1b8   :  { %994 = vmatpush.msrb.mxu2 %v2563_v54  ;;  %1014 = vmatpush.msrb.mxu3 %v2566_v11 }
 0x1b9   :  { %955 = vmatpush.msrb.mxu0 %v2569_v7  ;;  %975 = vmatpush.msrb.mxu1 %v2572_v63 }
 0x1ba   :  { %995 = vmatpush.msrb.mxu2 %v2575_v38  ;;  %1015 = vmatpush.msrb.mxu3 %v2578_v1 }
 0x1bb   :  { %956 = vmatpush.msrb.mxu0 %v2581_v2  ;;  %976 = vmatpush.msrb.mxu1 %v2584_v8 }
 0x1bc   :  { %996 = vmatpush.msrb.mxu2 %v2587_v12  ;;  %1016 = vmatpush.msrb.mxu3 %v2590_v14 }
 0x1bd   :  { %957 = vmatpush.msrb.mxu0 %v2593_v15  ;;  %977 = vmatpush.msrb.mxu1 %v2596_v16 }
 0x1be   :  { %997 = vmatpush.msrb.mxu2 %v2125_v57  ;;  %1017 = vmatpush.msrb.mxu3 %v2600_v18  ;;  %v2616_v57 = vld [vmem:[#allocation3 + $0x88] sm:$0xff] }
 0x1bf   :  { %958 = vmatpush.msrb.mxu0 %v2603_v19  ;;  %978 = vmatpush.msrb.mxu1 %v2606_v20  ;;  %3105 = vst [vmem:[#allocation14_spill] sm:$0xff] %v2616_v57 }
 0x1c0   :  { %998 = vmatpush.msrb.mxu2 %v3074_v13  ;;  %1018 = vmatpush.msrb.mxu3 %v2610_v23  ;;  %v2626_v13 = vld [vmem:[#allocation3 + $0x68] sm:$0xff] }
 0x1c1   :  { %959 = vmatpush.msrb.mxu0 %v2613_v24  ;;  %979 = vmatpush.msrb.mxu1 %v2616_v57  ;;  %3108 = vst [vmem:[#allocation21_spill] sm:$0xff] %v2626_v13 }
 0x1c2   :  { %999 = vmatpush.msrb.mxu2 %v3078_v17  ;;  %1019 = vmatpush.msrb.mxu3 %v2620_v28  ;;  %v2634_v17 = vld [vmem:[#allocation3 + $0x48] sm:$0xff] }
 0x1c3   :  { %960 = vmatpush.msrb.mxu0 %v2623_v31  ;;  %980 = vmatpush.msrb.mxu1 %v2626_v13  ;;  %3110 = vst [vmem:[#allocation19_spill] sm:$0xff] %v2634_v17 }
 0x1c4   :  { %1000 = vmatpush.msrb.mxu2 %v3082_v21  ;;  %1020 = vmatpush.msrb.mxu3 %v3083_v22  ;;  %v2647_v21 = vld [vmem:[#allocation3] sm:$0xff] }
 0x1c5   :  { %961 = vmatpush.msrb.mxu0 %v2631_v35  ;;  %981 = vmatpush.msrb.mxu1 %v2634_v17  ;;  %3113 = vst [vmem:[#allocation20_spill] sm:$0xff] %v2647_v21 }
 0x1c6   :  { %1001 = vmatpush.msrb.mxu2 %v3086_v25  ;;  %1021 = vmatpush.msrb.mxu3 %v3087_v26  ;;  %v3114_v26 = vld [vmem:[#allocation41_spill] sm:$0xff] }
 0x1c7   :  { %962 = vmatpush.msrb.mxu0 %v2639_v36  ;;  %982 = vmatpush.msrb.mxu1 %v2642_v37  ;;  %v3116_v36 = vld [vmem:[#allocation44_spill] sm:$0xff] }
 0x1c8   :  { %1002 = vmatpush.msrb.mxu2 %v3090_v29  ;;  %1022 = vmatpush.msrb.mxu3 %v3091_v30 }
 0x1c9   :  { %963 = vmatpush.msrb.mxu0 %v2647_v21  ;;  %983 = vmatpush.msrb.mxu1 %v3093_v32 }
 0x1ca   :  { %1003 = vmatpush.msrb.mxu2 %v3094_v33  ;;  %1023 = vmatpush.msrb.mxu3 %v3095_v34 }
 0x226   :  { %v657_v22 = vpop.f32.mrf.mxu0  ;;  %v677_v25 = vpop.f32.mrf.mxu1 }
 0x227   :  { %v720_v39 = vadd.f32 %v657_v22, %v3114_v26  ;;  %v721_v41 = vadd.f32 %v677_v25, %v3115_v40  ;;  %v3117_v25 = vld [vmem:[#allocation43_spill] sm:$0xff] }
 0x229   :  { %v1637_v37 = vmul.f32 -1.442695, %v720_v39  ;;  %v1638_v29 = vmul.f32 -1.442695, %v721_v41 }
 0x22b   :  { %1697 = vpow2.f32 %v1637_v37 }
 0x22c   :  { %1699 = vpow2.f32 %v1638_v29 }
 0x22d   :  { %v717_v30 = vpop.f32.mrf.mxu3  ;;  %v697_v34 = vpop.f32.mrf.mxu2 }
 0x22e   :  { %v723_v17 = vadd.f32 %v717_v30, %v3116_v36  ;;  %v722_v39 = vadd.f32 %v697_v34, %v3117_v25 }
 0x230   :  { %v1639_v21 = vmul.f32 -1.442695, %v723_v17 }
 0x231   :  { %v1698_v35 = vpop.eup %1697 }
 0x232   :  { %v1700_v32 = vpop.eup %1699  ;;  %v727_v13 = vadd.f32 1.0, %v1698_v35  ;;  %1701 = vpow2.f32 %v1639_v21 }
 0x233   :  { %v746_v33 = vadd.f32 1.0, %v1700_v32 }
 0x234   :  { %1703 = vrcp.f32 %v727_v13  ;;  %v739_v17 = vand.u32 2147483648, %v727_v13  ;;  %v737_v21 = vand.u32 2147483647, %v727_v13  ;;  %vm733_vm12 = vweird.f32 %v727_v13 }
 0x235   :  { %1705 = vrcp.f32 %v746_v33  ;;  %v758_v30 = vand.u32 2147483648, %v746_v33  ;;  %v756_v28 = vand.u32 2147483647, %v746_v33  ;;  %vm752_vm13 = vweird.f32 %v746_v33 }
 0x236   :  { %v740_v34 = vor.u32 1.1754944e-38, %v739_v17  ;;  %vm738_vm0 = vcmp.eq.f32.partialorder %v737_v21, 8.507059e+37 }
 0x237   :  { %vm757_vm1 = vcmp.eq.f32.partialorder %v756_v28, 8.507059e+37 }
 0x238   :  { %v1702_v31 = vpop.eup %1701 }
 0x239   :  { %v766_v22 = vadd.f32 1.0, %v1702_v31 }
 0x23a   :  { %v1704_v26 = vpop.eup %1703 }
 0x23b   :  { %v1706_v40 = vpop.eup %1705  ;;  %v729_v37 = vmul.f32 %v1704_v26, %v727_v13  ;;  %1707 = vrcp.f32 %v766_v22  ;;  %vm734_vm10 = vweird.f32 %v1704_v26  ;;  %v778_v17 = vand.u32 2147483648, %v766_v22 }
 0x23c   :  { %v748_v41 = vmul.f32 %v1706_v40, %v746_v33  ;;  %1709 = vtanh.f32 %v722_v39  ;;  %vm753_vm11 = vweird.f32 %v1706_v40  ;;  %vm735_vm14 = vmor %vm733_vm12, %vm734_vm10  ;;  %vm772_vm3 = vweird.f32 %v766_v22 }
 0x23d   :  { %v730_v29 = vsub.f32 1.0, %v729_v37  ;;  %vm754_vm15 = vmor %vm752_vm13, %vm753_vm11  ;;  %v759_v37 = vor.u32 1.1754944e-38, %v758_v30  ;;  %v779_v21 = vor.u32 1.1754944e-38, %v778_v17  ;;  %v3136_v17 = vld [vmem:[#allocation32_spill] sm:$0xff] }
 0x23e   :  { %v749_v36 = vsub.f32 1.0, %v748_v41 }
 0x23f   :  { %v731_v35 = vmul.f32 %v1704_v26, %v730_v29 }
 0x240   :  { %v750_v32 = vmul.f32 %v1706_v40, %v749_v36 }
 0x241   :  { %v1708_v57 = vpop.eup %1707  ;;  %v732_v31 = vadd.f32 %v1704_v26, %v731_v35 }
 0x242   :  { %v751_v25 = vadd.f32 %v1706_v40, %v750_v32  ;;  %v768_v24 = vmul.f32 %v1708_v57, %v766_v22  ;;  %v1710_v39 = vpop.eup %1709  ;;  %vm773_vm2 = vweird.f32 %v1708_v57  ;;  %v3125_v32 = vld [vmem:[#allocation14_spill] sm:$0xff] }
 0x243   :  { %v736_v41 = vsel %vm735_vm14, %v1704_v26, %v732_v31  ;;  %v776_v26 = vand.u32 2147483647, %v766_v22  ;;  %vm774_vm4 = vmor %vm772_vm3, %vm773_vm2  ;;  %v3124_v22 = vld [vmem:[#allocation18_spill] sm:$0xff]  ;;  %v2711_v31 = vld [vmem:[#allocation3 + $0x90] sm:$0xff] }
 0x244   :  { %v741_v23 = vsel %vm738_vm0, %v740_v34, %v736_v41  ;;  %v755_v29 = vsel %vm754_vm15, %v1706_v40, %v751_v25  ;;  %v769_v20 = vsub.f32 1.0, %v768_v24  ;;  %3126 = vst [vmem:[#allocation29_spill] sm:$0xff] %v2711_v31  ;;  %v3127_v34 = vld [vmem:[#allocation16_spill] sm:$0xff]  ;;  %v3128_v25 = vld [vmem:[#allocation27_spill] sm:$0xff] }
 0x245   :  { %v760_v36 = vsel %vm757_vm1, %v759_v37, %v755_v29  ;;  %v783_v19 = vmul.f32 %v1710_v39, %v741_v23  ;;  %vm777_vm5 = vcmp.eq.f32.partialorder %v776_v26, 8.507059e+37  ;;  %v2705_v23 = vld [vmem:[#allocation3 + $0xb0] sm:$0xff]  ;;  %v3129_v37 = vld [vmem:[#allocation21_spill] sm:$0xff] }
 0x246   :  { %v782_v18 = vmul.f32 %v760_v36, %v2482_v27  ;;  %v770_v35 = vmul.f32 %v1708_v57, %v769_v20  ;;  %v2699_v27 = vld [vmem:[#allocation3 + $0xd0] sm:$0xff]  ;;  %v3121_v20 = vld [vmem:[#allocation13_spill] sm:$0xff]  ;;  %3122 = vst [vmem:[#allocation34_spill] sm:$0xff] %v2705_v23  ;;  %v3133_v36 = vld [vmem:[#allocation19_spill] sm:$0xff] }
 0x247   :  { %3118 = vst [vmem:[#allocation22_spill] sm:$0xff] %v2699_v27  ;;  %v2717_v41 = vld [vmem:[#allocation3 + $0x70] sm:$0xff]  ;;  %v2720_v39 = vld [vmem:[#allocation3 + $0x78] sm:$0xff] }
 0x248   :  { %v2658_v13 = vadd.f32 %v783_v19, %v782_v18  ;;  %v771_v33 = vadd.f32 %v1708_v57, %v770_v35  ;;  %v3119_v18 = vld [vmem:[#allocation15_spill] sm:$0xff]  ;;  %v3120_v19 = vld [vmem:[#allocation12_spill] sm:$0xff]  ;;  %3130 = vst [vmem:[#allocation24_spill] sm:$0xff] %v2717_v41  ;;  %v3132_v29 = vld [vmem:[#allocation17_spill] sm:$0xff] }
 0x249   :  { %3131 = vst [vmem:[#allocation26_spill] sm:$0xff] %v2720_v39  ;;  %v2725_v35 = vld [vmem:[#allocation3 + $0x50] sm:$0xff]  ;;  %v3137_v26 = vld [vmem:[#allocation25_spill] sm:$0xff] }
 0x24a   :  { %1711 = vtanh.f32 %v2658_v13  ;;  %v775_v30 = vsel %vm774_vm4, %v1708_v57, %v771_v33  ;;  %v3123_v57 = vld [vmem:[#allocation23_spill] sm:$0xff]  ;;  %3134 = vst [vmem:[#allocation35_spill] sm:$0xff] %v2725_v35  ;;  %v2728_v33 = vld [vmem:[#allocation3 + $0x58] sm:$0xff] }
 0x24b   :  { %v780_v24 = vsel %vm777_vm5, %v779_v21, %v775_v30  ;;  %3135 = vst [vmem:[#allocation31_spill] sm:$0xff] %v2728_v33  ;;  %v2733_v30 = vld [vmem:[#allocation3 + $0x30] sm:$0xff]  ;;  %v2736_v21 = vld [vmem:[#allocation3 + $0x38] sm:$0xff] }
 0x24c   :  { %3138 = vst [vmem:[#allocation28_spill] sm:$0xff] %v2733_v30 }
 0x24d   :  { %3139 = vst [vmem:[#allocation30_spill] sm:$0xff] %v2736_v21 }
 0x250   :  { %v1712_v28 = vpop.eup %1711 }
 0x251   :  { %v786_v40 = vmul.f32 %v1712_v28, %v780_v24  ;;  %v3140_v28 = vld [vmem:[#allocation20_spill] sm:$0xff]  ;;  %v2740_v24 = vld [vmem:[#allocation3 + $0x8] sm:$0xff] }
 0x252   :  { %3141 = vst [vmem:[#allocation36_spill] sm:$0xff] %v2740_v24 }
 0x253   :  { %810 = vmatmul.f32.vlgmr.msra.gmra.mxu0 %v786_v40  ;;  %830 = vmatmul.f32.vlgmr.msra.gmra.mxu1 %v786_v40 }
 0x254   :  { %850 = vmatmul.f32.vlgmr.msra.gmra.mxu2 %v786_v40  ;;  %870 = vmatmul.f32.vlgmr.msra.gmra.mxu3 %v786_v40  ;;  %v2743_v40 = vld [vmem:[#allocation3 + $0x10] sm:$0xff] }
 0x255   :  { %1102 = vmatpush.msra.mxu0 %v2485_v50  ;;  %1122 = vmatpush.msra.mxu1 %v2488_v42  ;;  %3142 = vst [vmem:[#allocation33_spill] sm:$0xff] %v2743_v40 }
 0x256   :  { %1142 = vmatpush.msra.mxu2 %v2491_v43  ;;  %1162 = vmatpush.msra.mxu3 %v2494_v44 }
 0x257   :  { %1103 = vmatpush.msra.mxu0 %v2497_v45  ;;  %1123 = vmatpush.msra.mxu1 %v2500_v46 }
 0x258   :  { %1143 = vmatpush.msra.mxu2 %v2503_v47  ;;  %1163 = vmatpush.msra.mxu3 %v2506_v49 }
 0x259   :  { %1104 = vmatpush.msra.mxu0 %v2509_v51  ;;  %1124 = vmatpush.msra.mxu1 %v2512_v53 }
 0x25a   :  { %1144 = vmatpush.msra.mxu2 %v2515_v3  ;;  %1164 = vmatpush.msra.mxu3 %v2518_v56 }
 0x25b   :  { %1105 = vmatpush.msra.mxu0 %v2521_v61  ;;  %1125 = vmatpush.msra.mxu1 %v2524_v0 }
 0x25c   :  { %1145 = vmatpush.msra.mxu2 %v2527_v10  ;;  %1165 = vmatpush.msra.mxu3 %v2530_v52 }
 0x25d   :  { %1106 = vmatpush.msra.mxu0 %v2533_v48  ;;  %1126 = vmatpush.msra.mxu1 %v2536_v58 }
 0x25e   :  { %1146 = vmatpush.msra.mxu2 %v2539_v6  ;;  %1166 = vmatpush.msra.mxu3 %v2542_v4 }
 0x25f   :  { %1107 = vmatpush.msra.mxu0 %v2545_v62  ;;  %1127 = vmatpush.msra.mxu1 %v2548_v59 }
 0x260   :  { %1147 = vmatpush.msra.mxu2 %v2551_v55  ;;  %1167 = vmatpush.msra.mxu3 %v2554_v5 }
 0x261   :  { %1108 = vmatpush.msra.mxu0 %v2557_v9  ;;  %1128 = vmatpush.msra.mxu1 %v2560_v60 }
 0x262   :  { %1148 = vmatpush.msra.mxu2 %v2563_v54  ;;  %1168 = vmatpush.msra.mxu3 %v2566_v11 }
 0x263   :  { %1109 = vmatpush.msra.mxu0 %v2569_v7  ;;  %1129 = vmatpush.msra.mxu1 %v2572_v63 }
 0x264   :  { %1149 = vmatpush.msra.mxu2 %v2575_v38  ;;  %1169 = vmatpush.msra.mxu3 %v2578_v1 }
 0x265   :  { %1110 = vmatpush.msra.mxu0 %v2581_v2  ;;  %1130 = vmatpush.msra.mxu1 %v2584_v8 }
 0x266   :  { %1150 = vmatpush.msra.mxu2 %v2587_v12  ;;  %1170 = vmatpush.msra.mxu3 %v2590_v14 }
 0x267   :  { %1111 = vmatpush.msra.mxu0 %v2593_v15  ;;  %1131 = vmatpush.msra.mxu1 %v2596_v16 }
 0x268   :  { %1151 = vmatpush.msra.mxu2 %v2699_v27  ;;  %1171 = vmatpush.msra.mxu3 %v3119_v18 }
 0x269   :  { %1112 = vmatpush.msra.mxu0 %v3120_v19  ;;  %1132 = vmatpush.msra.mxu1 %v3121_v20 }
 0x26a   :  { %1152 = vmatpush.msra.mxu2 %v2705_v23  ;;  %1172 = vmatpush.msra.mxu3 %v3123_v57 }
 0x26b   :  { %1113 = vmatpush.msra.mxu0 %v3124_v22  ;;  %1133 = vmatpush.msra.mxu1 %v3125_v32 }
 0x26c   :  { %1153 = vmatpush.msra.mxu2 %v2711_v31  ;;  %1173 = vmatpush.msra.mxu3 %v3127_v34 }
 0x26d   :  { %1114 = vmatpush.msra.mxu0 %v3128_v25  ;;  %1134 = vmatpush.msra.mxu1 %v3129_v37 }
 0x26e   :  { %1154 = vmatpush.msra.mxu2 %v2717_v41  ;;  %1174 = vmatpush.msra.mxu3 %v2720_v39 }
 0x26f   :  { %1115 = vmatpush.msra.mxu0 %v3132_v29  ;;  %1135 = vmatpush.msra.mxu1 %v3133_v36  ;;  %v3145_v36 = vld [vmem:[#allocation46_spill] sm:$0xff] }
 0x270   :  { %1155 = vmatpush.msra.mxu2 %v2725_v35  ;;  %1175 = vmatpush.msra.mxu3 %v2728_v33  ;;  %v3144_v33 = vld [vmem:[#allocation45_spill] sm:$0xff] }
 0x271   :  { %1116 = vmatpush.msra.mxu0 %v3136_v17  ;;  %1136 = vmatpush.msra.mxu1 %v3137_v26  ;;  %v2746_v17 = vld [vmem:[#allocation3 + $0x18] sm:$0xff] }
 0x272   :  { %1156 = vmatpush.msra.mxu2 %v2733_v30  ;;  %1176 = vmatpush.msra.mxu3 %v2736_v21  ;;  %3143 = vst [vmem:[#allocation37_spill] sm:$0xff] %v2746_v17 }
 0x273   :  { %1117 = vmatpush.msra.mxu0 %v3140_v28  ;;  %1137 = vmatpush.msra.mxu1 %v2740_v24  ;;  %v3146_v24 = vld [vmem:[#allocation48_spill] sm:$0xff] }
 0x274   :  { %1157 = vmatpush.msra.mxu2 %v2743_v40  ;;  %1177 = vmatpush.msra.mxu3 %v2746_v17 }
 0x2d0   :  { %v811_v26 = vpop.f32.mrf.mxu0  ;;  %v831_v30 = vpop.f32.mrf.mxu1 }
 0x2d1   :  { %v874_v35 = vadd.f32 %v811_v26, %v3144_v33  ;;  %v875_v21 = vadd.f32 %v831_v30, %v3145_v36  ;;  %v3147_v36 = vld [vmem:[#allocation47_spill] sm:$0xff] }
 0x2d3   :  { %v1640_v29 = vmul.f32 -1.442695, %v874_v35  ;;  %v1641_v28 = vmul.f32 -1.442695, %v875_v21 }
 0x2d5   :  { %1713 = vpow2.f32 %v1640_v29 }
 0x2d6   :  { %1715 = vpow2.f32 %v1641_v28 }
 0x2d7   :  { %v871_v39 = vpop.f32.mrf.mxu3  ;;  %v851_v17 = vpop.f32.mrf.mxu2 }
 0x2d8   :  { %v877_v41 = vadd.f32 %v871_v39, %v3146_v24  ;;  %v876_v35 = vadd.f32 %v851_v17, %v3147_v36 }
 0x2da   :  { %v1642_v37 = vmul.f32 -1.442695, %v877_v41 }
 0x2db   :  { %v1714_v25 = vpop.eup %1713 }
 0x2dc   :  { %v1716_v40 = vpop.eup %1715  ;;  %v881_v34 = vadd.f32 1.0, %v1714_v25  ;;  %1717 = vpow2.f32 %v1642_v37 }
 0x2dd   :  { %v900_v31 = vadd.f32 1.0, %v1716_v40 }
 0x2de   :  { %1719 = vrcp.f32 %v881_v34  ;;  %v893_v41 = vand.u32 2147483648, %v881_v34  ;;  %v891_v37 = vand.u32 2147483647, %v881_v34  ;;  %vm887_vm8 = vweird.f32 %v881_v34 }
 0x2df   :  { %1721 = vrcp.f32 %v900_v31  ;;  %v912_v24 = vand.u32 2147483648, %v900_v31  ;;  %v910_v22 = vand.u32 2147483647, %v900_v31  ;;  %vm906_vm9 = vweird.f32 %v900_v31 }
 0x2e0   :  { %v894_v17 = vor.u32 1.1754944e-38, %v893_v41  ;;  %vm892_vm12 = vcmp.eq.f32.partialorder %v891_v37, 8.507059e+37 }
 0x2e1   :  { %vm911_vm13 = vcmp.eq.f32.partialorder %v910_v22, 8.507059e+37 }
 0x2e2   :  { %v1718_v32 = vpop.eup %1717 }
 0x2e3   :  { %v920_v33 = vadd.f32 1.0, %v1718_v32 }
 0x2e4   :  { %v1720_v26 = vpop.eup %1719 }
 0x2e5   :  { %v1722_v30 = vpop.eup %1721  ;;  %v883_v29 = vmul.f32 %v1720_v26, %v881_v34  ;;  %1723 = vrcp.f32 %v920_v33  ;;  %vm888_vm6 = vweird.f32 %v1720_v26  ;;  %v932_v41 = vand.u32 2147483648, %v920_v33 }
 0x2e6   :  { %v902_v21 = vmul.f32 %v1722_v30, %v900_v31  ;;  %1725 = vtanh.f32 %v876_v35  ;;  %vm907_vm7 = vweird.f32 %v1722_v30  ;;  %vm889_vm10 = vmor %vm887_vm8, %vm888_vm6  ;;  %vm926_vm15 = vweird.f32 %v920_v33 }
 0x2e7   :  { %v884_v28 = vsub.f32 1.0, %v883_v29  ;;  %vm908_vm11 = vmor %vm906_vm9, %vm907_vm7  ;;  %v913_v29 = vor.u32 1.1754944e-38, %v912_v24  ;;  %v933_v37 = vor.u32 1.1754944e-38, %v932_v41  ;;  %v3166_v41 = vld [vmem:[#allocation32_spill] sm:$0xff] }
 0x2e8   :  { %v903_v39 = vsub.f32 1.0, %v902_v21 }
 0x2e9   :  { %v885_v25 = vmul.f32 %v1720_v26, %v884_v28 }
 0x2ea   :  { %v904_v40 = vmul.f32 %v1722_v30, %v903_v39 }
 0x2eb   :  { %v1724_v57 = vpop.eup %1723  ;;  %v886_v32 = vadd.f32 %v1720_v26, %v885_v25 }
 0x2ec   :  { %v905_v36 = vadd.f32 %v1722_v30, %v904_v40  ;;  %v922_v23 = vmul.f32 %v1724_v57, %v920_v33  ;;  %v1726_v35 = vpop.eup %1725  ;;  %vm927_vm14 = vweird.f32 %v1724_v57  ;;  %v3155_v40 = vld [vmem:[#allocation14_spill] sm:$0xff] }
 0x2ed   :  { %v890_v21 = vsel %vm889_vm10, %v1720_v26, %v886_v32  ;;  %v930_v26 = vand.u32 2147483647, %v920_v33  ;;  %vm928_vm0 = vmor %vm926_vm15, %vm927_vm14  ;;  %v3154_v33 = vld [vmem:[#allocation18_spill] sm:$0xff]  ;;  %v3156_v32 = vld [vmem:[#allocation29_spill] sm:$0xff] }
 0x2ee   :  { %v895_v20 = vsel %vm892_vm12, %v894_v17, %v890_v21  ;;  %v909_v28 = vsel %vm908_vm11, %v1722_v30, %v905_v36  ;;  %v923_v19 = vsub.f32 1.0, %v922_v23  ;;  %v3157_v17 = vld [vmem:[#allocation16_spill] sm:$0xff]  ;;  %v3158_v36 = vld [vmem:[#allocation27_spill] sm:$0xff] }
 0x2ef   :  { %v914_v39 = vsel %vm911_vm13, %v913_v29, %v909_v28  ;;  %v937_v18 = vmul.f32 %v1726_v35, %v895_v20  ;;  %vm931_vm1 = vcmp.eq.f32.partialorder %v930_v26, 8.507059e+37  ;;  %v3152_v20 = vld [vmem:[#allocation34_spill] sm:$0xff]  ;;  %v3159_v29 = vld [vmem:[#allocation21_spill] sm:$0xff]  ;;  %v3160_v21 = vld [vmem:[#allocation24_spill] sm:$0xff] }
 0x2f0   :  { %v936_v27 = vmul.f32 %v914_v39, %v2658_v13  ;;  %v924_v25 = vmul.f32 %v1724_v57, %v923_v19  ;;  %v3148_v13 = vld [vmem:[#allocation22_spill] sm:$0xff]  ;;  %v3151_v19 = vld [vmem:[#allocation13_spill] sm:$0xff]  ;;  %v3163_v39 = vld [vmem:[#allocation19_spill] sm:$0xff] }
 0x2f1   :  { %v3161_v35 = vld [vmem:[#allocation26_spill] sm:$0xff]  ;;  %v3162_v28 = vld [vmem:[#allocation17_spill] sm:$0xff] }
 0x2f2   :  { %v2754_v34 = vadd.f32 %v937_v18, %v936_v27  ;;  %v925_v31 = vadd.f32 %v1724_v57, %v924_v25  ;;  %v3149_v27 = vld [vmem:[#allocation15_spill] sm:$0xff]  ;;  %v3150_v18 = vld [vmem:[#allocation12_spill] sm:$0xff]  ;;  %v3167_v26 = vld [vmem:[#allocation25_spill] sm:$0xff] }
 0x2f3   :  { %v3164_v25 = vld [vmem:[#allocation35_spill] sm:$0xff] }
 0x2f4   :  { %1727 = vtanh.f32 %v2754_v34  ;;  %v929_v24 = vsel %vm928_vm0, %v1724_v57, %v925_v31  ;;  %v3153_v57 = vld [vmem:[#allocation23_spill] sm:$0xff] }
 0x2f5   :  { %v934_v23 = vsel %vm931_vm1, %v933_v37, %v929_v24  ;;  %v3165_v31 = vld [vmem:[#allocation31_spill] sm:$0xff]  ;;  %v3168_v24 = vld [vmem:[#allocation28_spill] sm:$0xff]  ;;  %v3169_v37 = vld [vmem:[#allocation30_spill] sm:$0xff] }
 0x2fa   :  { %v1728_v22 = vpop.eup %1727 }
 0x2fb   :  { %v940_v30 = vmul.f32 %v1728_v22, %v934_v23  ;;  %v3170_v22 = vld [vmem:[#allocation20_spill] sm:$0xff] }
 0x2fc   :  { %v3171_v23 = vld [vmem:[#allocation36_spill] sm:$0xff] }
 0x2fd   :  { %964 = vmatmul.f32.vlgmr.msrb.gmra.mxu0 %v940_v30  ;;  %984 = vmatmul.f32.vlgmr.msrb.gmra.mxu1 %v940_v30 }
 0x2fe   :  { %1004 = vmatmul.f32.vlgmr.msrb.gmra.mxu2 %v940_v30  ;;  %1024 = vmatmul.f32.vlgmr.msrb.gmra.mxu3 %v940_v30  ;;  %v3172_v30 = vld [vmem:[#allocation33_spill] sm:$0xff] }
 0x2ff   :  { %1256 = vmatpush.msrb.mxu0 %v2485_v50  ;;  %1276 = vmatpush.msrb.mxu1 %v2488_v42 }
 0x300   :  { %1296 = vmatpush.msrb.mxu2 %v2491_v43  ;;  %1316 = vmatpush.msrb.mxu3 %v2494_v44 }
 0x301   :  { %1257 = vmatpush.msrb.mxu0 %v2497_v45  ;;  %1277 = vmatpush.msrb.mxu1 %v2500_v46 }
 0x302   :  { %1297 = vmatpush.msrb.mxu2 %v2503_v47  ;;  %1317 = vmatpush.msrb.mxu3 %v2506_v49 }
 0x303   :  { %1258 = vmatpush.msrb.mxu0 %v2509_v51  ;;  %1278 = vmatpush.msrb.mxu1 %v2512_v53 }
 0x304   :  { %1298 = vmatpush.msrb.mxu2 %v2515_v3  ;;  %1318 = vmatpush.msrb.mxu3 %v2518_v56 }
 0x305   :  { %1259 = vmatpush.msrb.mxu0 %v2521_v61  ;;  %1279 = vmatpush.msrb.mxu1 %v2524_v0 }
 0x306   :  { %1299 = vmatpush.msrb.mxu2 %v2527_v10  ;;  %1319 = vmatpush.msrb.mxu3 %v2530_v52 }
 0x307   :  { %1260 = vmatpush.msrb.mxu0 %v2533_v48  ;;  %1280 = vmatpush.msrb.mxu1 %v2536_v58 }
 0x308   :  { %1300 = vmatpush.msrb.mxu2 %v2539_v6  ;;  %1320 = vmatpush.msrb.mxu3 %v2542_v4 }
 0x309   :  { %1261 = vmatpush.msrb.mxu0 %v2545_v62  ;;  %1281 = vmatpush.msrb.mxu1 %v2548_v59 }
 0x30a   :  { %1301 = vmatpush.msrb.mxu2 %v2551_v55  ;;  %1321 = vmatpush.msrb.mxu3 %v2554_v5 }
 0x30b   :  { %1262 = vmatpush.msrb.mxu0 %v2557_v9  ;;  %1282 = vmatpush.msrb.mxu1 %v2560_v60 }
 0x30c   :  { %1302 = vmatpush.msrb.mxu2 %v2563_v54  ;;  %1322 = vmatpush.msrb.mxu3 %v2566_v11 }
 0x30d   :  { %1263 = vmatpush.msrb.mxu0 %v2569_v7  ;;  %1283 = vmatpush.msrb.mxu1 %v2572_v63 }
 0x30e   :  { %1303 = vmatpush.msrb.mxu2 %v2575_v38  ;;  %1323 = vmatpush.msrb.mxu3 %v2578_v1 }
 0x30f   :  { %1264 = vmatpush.msrb.mxu0 %v2581_v2  ;;  %1284 = vmatpush.msrb.mxu1 %v2584_v8 }
 0x310   :  { %1304 = vmatpush.msrb.mxu2 %v2587_v12  ;;  %1324 = vmatpush.msrb.mxu3 %v2590_v14 }
 0x311   :  { %1265 = vmatpush.msrb.mxu0 %v2593_v15  ;;  %1285 = vmatpush.msrb.mxu1 %v2596_v16 }
 0x312   :  { %1305 = vmatpush.msrb.mxu2 %v3148_v13  ;;  %1325 = vmatpush.msrb.mxu3 %v3149_v27 }
 0x313   :  { %1266 = vmatpush.msrb.mxu0 %v3150_v18  ;;  %1286 = vmatpush.msrb.mxu1 %v3151_v19 }
 0x314   :  { %1306 = vmatpush.msrb.mxu2 %v3152_v20  ;;  %1326 = vmatpush.msrb.mxu3 %v3153_v57 }
 0x315   :  { %1267 = vmatpush.msrb.mxu0 %v3154_v33  ;;  %1287 = vmatpush.msrb.mxu1 %v3155_v40 }
 0x316   :  { %1307 = vmatpush.msrb.mxu2 %v3156_v32  ;;  %1327 = vmatpush.msrb.mxu3 %v3157_v17 }
 0x317   :  { %1268 = vmatpush.msrb.mxu0 %v3158_v36  ;;  %1288 = vmatpush.msrb.mxu1 %v3159_v29 }
 0x318   :  { %1308 = vmatpush.msrb.mxu2 %v3160_v21  ;;  %1328 = vmatpush.msrb.mxu3 %v3161_v35  ;;  %v3174_v35 = vld [vmem:[#allocation49_spill] sm:$0xff]  ;;  %v3175_v21 = vld [vmem:[#allocation50_spill] sm:$0xff] }
 0x319   :  { %1269 = vmatpush.msrb.mxu0 %v3162_v28  ;;  %1289 = vmatpush.msrb.mxu1 %v3163_v39  ;;  %v3173_v28 = vld [vmem:[#allocation37_spill] sm:$0xff] }
 0x31a   :  { %1309 = vmatpush.msrb.mxu2 %v3164_v25  ;;  %1329 = vmatpush.msrb.mxu3 %v3165_v31 }
 0x31b   :  { %1270 = vmatpush.msrb.mxu0 %v3166_v41  ;;  %1290 = vmatpush.msrb.mxu1 %v3167_v26 }
 0x31c   :  { %1310 = vmatpush.msrb.mxu2 %v3168_v24  ;;  %1330 = vmatpush.msrb.mxu3 %v3169_v37  ;;  %v3176_v37 = vld [vmem:[#allocation52_spill] sm:$0xff] }
 0x31d   :  { %1271 = vmatpush.msrb.mxu0 %v3170_v22  ;;  %1291 = vmatpush.msrb.mxu1 %v3171_v23 }
 0x31e   :  { %1311 = vmatpush.msrb.mxu2 %v3172_v30  ;;  %1331 = vmatpush.msrb.mxu3 %v3173_v28 }
 0x37a   :  { %v965_v39 = vpop.f32.mrf.mxu0  ;;  %v985_v25 = vpop.f32.mrf.mxu1 }
 0x37b   :  { %v1028_v31 = vadd.f32 %v965_v39, %v3174_v35  ;;  %v1029_v41 = vadd.f32 %v985_v25, %v3175_v21  ;;  %v3177_v21 = vld [vmem:[#allocation51_spill] sm:$0xff] }
 0x37d   :  { %v1643_v29 = vmul.f32 -1.442695, %v1028_v31  ;;  %v1644_v26 = vmul.f32 -1.442695, %v1029_v41 }
 0x37f   :  { %1729 = vpow2.f32 %v1643_v29 }
 0x380   :  { %1731 = vpow2.f32 %v1644_v26 }
 0x381   :  { %v1025_v24 = vpop.f32.mrf.mxu3  ;;  %v1005_v28 = vpop.f32.mrf.mxu2 }
 0x382   :  { %v1031_v36 = vadd.f32 %v1025_v24, %v3176_v37  ;;  %v1030_v25 = vadd.f32 %v1005_v28, %v3177_v21 }
 0x384   :  { %v1645_v22 = vmul.f32 -1.442695, %v1031_v36 }
 0x385   :  { %v1730_v17 = vpop.eup %1729 }
 0x386   :  { %v1732_v23 = vpop.eup %1731  ;;  %v1035_v32 = vadd.f32 1.0, %v1730_v17  ;;  %1733 = vpow2.f32 %v1645_v22 }
 0x387   :  { %v1054_v30 = vadd.f32 1.0, %v1732_v23 }
 0x388   :  { %1735 = vrcp.f32 %v1035_v32  ;;  %v1047_v36 = vand.u32 2147483648, %v1035_v32  ;;  %v1045_v22 = vand.u32 2147483647, %v1035_v32  ;;  %vm1041_vm4 = vweird.f32 %v1035_v32 }
 0x389   :  { %1737 = vrcp.f32 %v1054_v30  ;;  %v1066_v37 = vand.u32 2147483648, %v1054_v30  ;;  %v1064_v33 = vand.u32 2147483647, %v1054_v30  ;;  %vm1060_vm5 = vweird.f32 %v1054_v30 }
 0x38a   :  { %v1048_v28 = vor.u32 1.1754944e-38, %v1047_v36  ;;  %vm1046_vm8 = vcmp.eq.f32.partialorder %v1045_v22, 8.507059e+37 }
 0x38b   :  { %vm1065_vm9 = vcmp.eq.f32.partialorder %v1064_v33, 8.507059e+37 }
 0x38c   :  { %v1734_v40 = vpop.eup %1733 }
 0x38d   :  { %v1074_v35 = vadd.f32 1.0, %v1734_v40 }
 0x38e   :  { %v1736_v39 = vpop.eup %1735 }
 0x38f   :  { %v1738_v31 = vpop.eup %1737  ;;  %v1037_v29 = vmul.f32 %v1736_v39, %v1035_v32  ;;  %1739 = vrcp.f32 %v1074_v35  ;;  %vm1042_vm2 = vweird.f32 %v1736_v39  ;;  %v1086_v36 = vand.u32 2147483648, %v1074_v35 }
 0x390   :  { %v1056_v41 = vmul.f32 %v1738_v31, %v1054_v30  ;;  %1741 = vtanh.f32 %v1030_v25  ;;  %vm1061_vm3 = vweird.f32 %v1738_v31  ;;  %vm1043_vm6 = vmor %vm1041_vm4, %vm1042_vm2  ;;  %vm1080_vm11 = vweird.f32 %v1074_v35 }
 0x391   :  { %v1038_v26 = vsub.f32 1.0, %v1037_v29  ;;  %vm1062_vm7 = vmor %vm1060_vm5, %vm1061_vm3  ;;  %v1067_v29 = vor.u32 1.1754944e-38, %v1066_v37  ;;  %v1087_v22 = vor.u32 1.1754944e-38, %v1086_v36 }
 0x392   :  { %v1057_v24 = vsub.f32 1.0, %v1056_v41 }
 0x393   :  { %v1039_v17 = vmul.f32 %v1736_v39, %v1038_v26 }
 0x394   :  { %v1058_v23 = vmul.f32 %v1738_v31, %v1057_v24 }
 0x395   :  { %v1740_v57 = vpop.eup %1739  ;;  %v1040_v40 = vadd.f32 %v1736_v39, %v1039_v17 }
 0x396   :  { %v1059_v21 = vadd.f32 %v1738_v31, %v1058_v23  ;;  %v1076_v20 = vmul.f32 %v1740_v57, %v1074_v35  ;;  %v1742_v25 = vpop.eup %1741  ;;  %vm1081_vm10 = vweird.f32 %v1740_v57 }
 0x397   :  { %v1044_v41 = vsel %vm1043_vm6, %v1736_v39, %v1040_v40  ;;  %v1084_v39 = vand.u32 2147483647, %v1074_v35  ;;  %vm1082_vm12 = vmor %vm1080_vm11, %vm1081_vm10  ;;  %v3207_v40 = vld [vmem:[#allocation55_spill] sm:$0xff] }
 0x398   :  { %v1049_v19 = vsel %vm1046_vm8, %v1048_v28, %v1044_v41  ;;  %v1063_v26 = vsel %vm1062_vm7, %v1738_v31, %v1059_v21  ;;  %v1077_v18 = vsub.f32 1.0, %v1076_v20 }
 0x399   :  { %v1068_v24 = vsel %vm1065_vm9, %v1067_v29, %v1063_v26  ;;  %v1091_v27 = vmul.f32 %v1742_v25, %v1049_v19  ;;  %vm1085_vm13 = vcmp.eq.f32.partialorder %v1084_v39, 8.507059e+37 }
 0x39a   :  { %v1090_v13 = vmul.f32 %v1068_v24, %v2754_v34  ;;  %v1078_v17 = vmul.f32 %v1740_v57, %v1077_v18 }
 0x39c   :  { %v2826_v32 = vadd.f32 %v1091_v27, %v1090_v13  ;;  %v1079_v30 = vadd.f32 %v1740_v57, %v1078_v17 }
 0x39e   :  { %1743 = vtanh.f32 %v2826_v32  ;;  %v1083_v37 = vsel %vm1082_vm12, %v1740_v57, %v1079_v30 }
 0x39f   :  { %v1088_v20 = vsel %vm1085_vm13, %v1087_v22, %v1083_v37 }
 0x3a4   :  { %v1744_v33 = vpop.eup %1743 }
 0x3a5   :  { %v1094_v31 = vmul.f32 %v1744_v33, %v1088_v20 }
 0x3a7   :  { %1118 = vmatmul.f32.vlgmr.msra.gmra.mxu0 %v1094_v31  ;;  %1138 = vmatmul.f32.vlgmr.msra.gmra.mxu1 %v1094_v31 }
 0x3a8   :  { %1158 = vmatmul.f32.vlgmr.msra.gmra.mxu2 %v1094_v31  ;;  %1178 = vmatmul.f32.vlgmr.msra.gmra.mxu3 %v1094_v31 }
 0x3a9   :  { %1410 = vmatpush.msra.mxu0 %v2485_v50  ;;  %1430 = vmatpush.msra.mxu1 %v2488_v42  ;;  %v3178_v50 = vld [vmem:[#allocation22_spill] sm:$0xff]  ;;  %v3179_v42 = vld [vmem:[#allocation15_spill] sm:$0xff] }
 0x3aa   :  { %1450 = vmatpush.msra.mxu2 %v2491_v43  ;;  %1470 = vmatpush.msra.mxu3 %v2494_v44  ;;  %v3180_v43 = vld [vmem:[#allocation12_spill] sm:$0xff]  ;;  %v3181_v44 = vld [vmem:[#allocation13_spill] sm:$0xff] }
 0x3ab   :  { %1411 = vmatpush.msra.mxu0 %v2497_v45  ;;  %1431 = vmatpush.msra.mxu1 %v2500_v46  ;;  %v3182_v45 = vld [vmem:[#allocation34_spill] sm:$0xff]  ;;  %v3183_v46 = vld [vmem:[#allocation23_spill] sm:$0xff] }
 0x3ac   :  { %1451 = vmatpush.msra.mxu2 %v2503_v47  ;;  %1471 = vmatpush.msra.mxu3 %v2506_v49  ;;  %v3184_v47 = vld [vmem:[#allocation18_spill] sm:$0xff] }
 0x3ad   :  { %1412 = vmatpush.msra.mxu0 %v2509_v51  ;;  %1432 = vmatpush.msra.mxu1 %v2512_v53  ;;  %v3185_v49 = vld [vmem:[#allocation14_spill] sm:$0xff]  ;;  %v3186_v51 = vld [vmem:[#allocation29_spill] sm:$0xff]  ;;  %v3187_v53 = vld [vmem:[#allocation16_spill] sm:$0xff] }
 0x3ae   :  { %1452 = vmatpush.msra.mxu2 %v2515_v3  ;;  %1472 = vmatpush.msra.mxu3 %v2518_v56  ;;  %v3188_v3 = vld [vmem:[#allocation27_spill] sm:$0xff]  ;;  %v3189_v56 = vld [vmem:[#allocation21_spill] sm:$0xff] }
 0x3af   :  { %1413 = vmatpush.msra.mxu0 %v2521_v61  ;;  %1433 = vmatpush.msra.mxu1 %v2524_v0  ;;  %v3190_v61 = vld [vmem:[#allocation24_spill] sm:$0xff]  ;;  %v3191_v0 = vld [vmem:[#allocation26_spill] sm:$0xff] }
 0x3b0   :  { %1453 = vmatpush.msra.mxu2 %v2527_v10  ;;  %1473 = vmatpush.msra.mxu3 %v2530_v52  ;;  %v3192_v10 = vld [vmem:[#allocation17_spill] sm:$0xff]  ;;  %v3193_v52 = vld [vmem:[#allocation19_spill] sm:$0xff] }
 0x3b1   :  { %1414 = vmatpush.msra.mxu0 %v2533_v48  ;;  %1434 = vmatpush.msra.mxu1 %v2536_v58  ;;  %v3194_v48 = vld [vmem:[#allocation35_spill] sm:$0xff] }
 0x3b2   :  { %1454 = vmatpush.msra.mxu2 %v2539_v6  ;;  %1474 = vmatpush.msra.mxu3 %v2542_v4  ;;  %v3195_v58 = vld [vmem:[#allocation31_spill] sm:$0xff]  ;;  %v3196_v6 = vld [vmem:[#allocation32_spill] sm:$0xff]  ;;  %v3197_v4 = vld [vmem:[#allocation25_spill] sm:$0xff] }
 0x3b3   :  { %1415 = vmatpush.msra.mxu0 %v2545_v62  ;;  %1435 = vmatpush.msra.mxu1 %v2548_v59  ;;  %v3198_v62 = vld [vmem:[#allocation28_spill] sm:$0xff]  ;;  %v3199_v59 = vld [vmem:[#allocation30_spill] sm:$0xff] }
 0x3b4   :  { %1455 = vmatpush.msra.mxu2 %v2551_v55  ;;  %1475 = vmatpush.msra.mxu3 %v2554_v5  ;;  %v3200_v55 = vld [vmem:[#allocation20_spill] sm:$0xff] }
 0x3b5   :  { %1416 = vmatpush.msra.mxu0 %v2557_v9  ;;  %1436 = vmatpush.msra.mxu1 %v2560_v60  ;;  %v3201_v5 = vld [vmem:[#allocation36_spill] sm:$0xff]  ;;  %v3202_v9 = vld [vmem:[#allocation33_spill] sm:$0xff] }
 0x3b6   :  { %1456 = vmatpush.msra.mxu2 %v2563_v54  ;;  %1476 = vmatpush.msra.mxu3 %v2566_v11  ;;  %v3203_v60 = vld [vmem:[#allocation37_spill] sm:$0xff] }
 0x3b7   :  { %1417 = vmatpush.msra.mxu0 %v2569_v7  ;;  %1437 = vmatpush.msra.mxu1 %v2572_v63  ;;  %v3204_v7 = vld [vmem:[#allocation53_spill] sm:$0xff] }
 0x3b8   :  { %1457 = vmatpush.msra.mxu2 %v2575_v38  ;;  %1477 = vmatpush.msra.mxu3 %v2578_v1  ;;  %v3205_v38 = vld [vmem:[#allocation54_spill] sm:$0xff] }
 0x3b9   :  { %1418 = vmatpush.msra.mxu0 %v2581_v2  ;;  %1438 = vmatpush.msra.mxu1 %v2584_v8 }
 0x3ba   :  { %1458 = vmatpush.msra.mxu2 %v2587_v12  ;;  %1478 = vmatpush.msra.mxu3 %v2590_v14  ;;  %v3206_v14 = vld [vmem:[#allocation56_spill] sm:$0xff] }
 0x3bb   :  { %1419 = vmatpush.msra.mxu0 %v2593_v15  ;;  %1439 = vmatpush.msra.mxu1 %v2596_v16 }
 0x3bc   :  { %1459 = vmatpush.msra.mxu2 %v3178_v50  ;;  %1479 = vmatpush.msra.mxu3 %v3179_v42 }
 0x3bd   :  { %1420 = vmatpush.msra.mxu0 %v3180_v43  ;;  %1440 = vmatpush.msra.mxu1 %v3181_v44 }
 0x3be   :  { %1460 = vmatpush.msra.mxu2 %v3182_v45  ;;  %1480 = vmatpush.msra.mxu3 %v3183_v46 }
 0x3bf   :  { %1421 = vmatpush.msra.mxu0 %v3184_v47  ;;  %1441 = vmatpush.msra.mxu1 %v3185_v49 }
 0x3c0   :  { %1461 = vmatpush.msra.mxu2 %v3186_v51  ;;  %1481 = vmatpush.msra.mxu3 %v3187_v53 }
 0x3c1   :  { %1422 = vmatpush.msra.mxu0 %v3188_v3  ;;  %1442 = vmatpush.msra.mxu1 %v3189_v56 }
 0x3c2   :  { %1462 = vmatpush.msra.mxu2 %v3190_v61  ;;  %1482 = vmatpush.msra.mxu3 %v3191_v0 }
 0x3c3   :  { %1423 = vmatpush.msra.mxu0 %v3192_v10  ;;  %1443 = vmatpush.msra.mxu1 %v3193_v52 }
 0x3c4   :  { %1463 = vmatpush.msra.mxu2 %v3194_v48  ;;  %1483 = vmatpush.msra.mxu3 %v3195_v58 }
 0x3c5   :  { %1424 = vmatpush.msra.mxu0 %v3196_v6  ;;  %1444 = vmatpush.msra.mxu1 %v3197_v4 }
 0x3c6   :  { %1464 = vmatpush.msra.mxu2 %v3198_v62  ;;  %1484 = vmatpush.msra.mxu3 %v3199_v59  ;;  %v3208_v59 = vld [vmem:[#allocation57_spill] sm:$0xff] }
 0x3c7   :  { %1425 = vmatpush.msra.mxu0 %v3200_v55  ;;  %1445 = vmatpush.msra.mxu1 %v3201_v5  ;;  %v3209_v5 = vld [vmem:[#allocation58_spill] sm:$0xff] }
 0x3c8   :  { %1465 = vmatpush.msra.mxu2 %v3202_v9  ;;  %1485 = vmatpush.msra.mxu3 %v3203_v60 }
 0x424   :  { %v1119_v54 = vpop.f32.mrf.mxu0  ;;  %v1139_v11 = vpop.f32.mrf.mxu1 }
 0x425   :  { %v1182_v63 = vadd.f32 %v1119_v54, %v3204_v7  ;;  %v1183_v1 = vadd.f32 %v1139_v11, %v3205_v38  ;;  %v3210_v7 = vld [vmem:[#allocation60_spill] sm:$0xff] }
 0x427   :  { %v1646_v2 = vmul.f32 -1.442695, %v1182_v63  ;;  %v1647_v8 = vmul.f32 -1.442695, %v1183_v1 }
 0x429   :  { %1745 = vpow2.f32 %v1646_v2 }
 0x42a   :  { %1747 = vpow2.f32 %v1647_v8 }
 0x42b   :  { %v1179_v12 = vpop.f32.mrf.mxu3  ;;  %v1159_v19 = vpop.f32.mrf.mxu2 }
 0x42c   :  { %v1185_v15 = vadd.f32 %v1179_v12, %v3206_v14  ;;  %v1184_v28 = vadd.f32 %v1159_v19, %v3207_v40 }
 0x42e   :  { %v1648_v16 = vmul.f32 -1.442695, %v1185_v15 }
 0x42f   :  { %v1746_v34 = vpop.eup %1745 }
 0x430   :  { %v1748_v13 = vpop.eup %1747  ;;  %v1189_v27 = vadd.f32 1.0, %v1746_v34  ;;  %1749 = vpow2.f32 %v1648_v16 }
 0x431   :  { %v1208_v18 = vadd.f32 1.0, %v1748_v13  ;;  %v3211_v13 = vld [vmem:[#allocation59_spill] sm:$0xff] }
 0x432   :  { %1751 = vrcp.f32 %v1189_v27  ;;  %v1201_v24 = vand.u32 2147483648, %v1189_v27  ;;  %v1199_v36 = vand.u32 2147483647, %v1189_v27  ;;  %vm1195_vm0 = vweird.f32 %v1189_v27 }
 0x433   :  { %1753 = vrcp.f32 %v1208_v18  ;;  %v1220_v17 = vand.u32 2147483648, %v1208_v18  ;;  %v1218_v37 = vand.u32 2147483647, %v1208_v18  ;;  %vm1214_vm1 = vweird.f32 %v1208_v18 }
 0x434   :  { %v1202_v20 = vor.u32 1.1754944e-38, %v1201_v24  ;;  %vm1200_vm4 = vcmp.eq.f32.partialorder %v1199_v36, 8.507059e+37 }
 0x435   :  { %v1221_v42 = vor.u32 1.1754944e-38, %v1220_v17  ;;  %vm1219_vm5 = vcmp.eq.f32.partialorder %v1218_v37, 8.507059e+37 }
 0x436   :  { %v1750_v57 = vpop.eup %1749 }
 0x437   :  { %v1228_v35 = vadd.f32 1.0, %v1750_v57 }
 0x438   :  { %v1752_v23 = vpop.eup %1751 }
 0x439   :  { %v1754_v21 = vpop.eup %1753  ;;  %v1191_v29 = vmul.f32 %v1752_v23, %v1189_v27  ;;  %1755 = vrcp.f32 %v1228_v35  ;;  %vm1196_vm14 = vweird.f32 %v1752_v23  ;;  %v1240_v0 = vand.u32 2147483648, %v1228_v35 }
 0x43a   :  { %v1210_v41 = vmul.f32 %v1754_v21, %v1208_v18  ;;  %1757 = vtanh.f32 %v1184_v28  ;;  %vm1215_vm15 = vweird.f32 %v1754_v21  ;;  %vm1197_vm2 = vmor %vm1195_vm0, %vm1196_vm14  ;;  %vm1234_vm7 = vweird.f32 %v1228_v35 }
 0x43b   :  { %v1192_v25 = vsub.f32 1.0, %v1191_v29  ;;  %vm1216_vm3 = vmor %vm1214_vm1, %vm1215_vm15  ;;  %v1238_v10 = vand.u32 2147483647, %v1228_v35  ;;  %v1241_v48 = vor.u32 1.1754944e-38, %v1240_v0 }
 0x43c   :  { %v1211_v26 = vsub.f32 1.0, %v1210_v41 }
 0x43d   :  { %v1193_v30 = vmul.f32 %v1752_v23, %v1192_v25  ;;  %vm1239_vm9 = vcmp.eq.f32.partialorder %v1238_v10, 8.507059e+37 }
 0x43e   :  { %v1212_v39 = vmul.f32 %v1754_v21, %v1211_v26 }
 0x43f   :  { %v1756_v22 = vpop.eup %1755  ;;  %v1194_v33 = vadd.f32 %v1752_v23, %v1193_v30 }
 0x440   :  { %v1213_v31 = vadd.f32 %v1754_v21, %v1212_v39  ;;  %v1230_v50 = vmul.f32 %v1756_v22, %v1228_v35  ;;  %v1758_v44 = vpop.eup %1757  ;;  %vm1235_vm6 = vweird.f32 %v1756_v22 }
 0x441   :  { %v1198_v43 = vsel %vm1197_vm2, %v1752_v23, %v1194_v33  ;;  %vm1236_vm8 = vmor %vm1234_vm7, %vm1235_vm6 }
 0x442   :  { %v1203_v45 = vsel %vm1200_vm4, %v1202_v20, %v1198_v43  ;;  %v1217_v46 = vsel %vm1216_vm3, %v1754_v21, %v1213_v31  ;;  %v1231_v47 = vsub.f32 1.0, %v1230_v50 }
 0x443   :  { %v1222_v49 = vsel %vm1219_vm5, %v1221_v42, %v1217_v46  ;;  %v1245_v51 = vmul.f32 %v1758_v44, %v1203_v45 }
 0x444   :  { %v1244_v53 = vmul.f32 %v1222_v49, %v2826_v32  ;;  %v1232_v3 = vmul.f32 %v1756_v22, %v1231_v47 }
 0x446   :  { %v2898_v56 = vadd.f32 %v1245_v51, %v1244_v53  ;;  %v1233_v61 = vadd.f32 %v1756_v22, %v1232_v3 }
 0x448   :  { %1759 = vtanh.f32 %v2898_v56  ;;  %v1237_v52 = vsel %vm1236_vm8, %v1756_v22, %v1233_v61 }
 0x449   :  { %v1242_v6 = vsel %vm1239_vm9, %v1241_v48, %v1237_v52  ;;  %v3212_v52 = vld [vmem:[#allocation61_spill] sm:$0xff] }
 0x44e   :  { %v1760_v58 = vpop.eup %1759 }
 0x44f   :  { %v1248_v4 = vmul.f32 %v1760_v58, %v1242_v6  ;;  %v3213_v58 = vld [vmem:[#allocation62_spill] sm:$0xff] }
 0x451   :  { %1272 = vmatmul.f32.vlgmr.msrb.gmra.mxu0 %v1248_v4  ;;  %1292 = vmatmul.f32.vlgmr.msrb.gmra.mxu1 %v1248_v4 }
 0x452   :  { %1312 = vmatmul.f32.vlgmr.msrb.gmra.mxu2 %v1248_v4  ;;  %1332 = vmatmul.f32.vlgmr.msrb.gmra.mxu3 %v1248_v4 }
 0x4ce   :  { %v1273_v32 = vpop.f32.mrf.mxu0  ;;  %v1293_v62 = vpop.f32.mrf.mxu1 }
 0x4cf   :  { %v1336_v55 = vadd.f32 %v1273_v32, %v3208_v59  ;;  %v1337_v9 = vadd.f32 %v1293_v62, %v3209_v5  ;;  %v3214_v59 = vld [vmem:[#allocation64_spill] sm:$0xff] }
 0x4d1   :  { %v1649_v60 = vmul.f32 -1.442695, %v1336_v55  ;;  %v1650_v54 = vmul.f32 -1.442695, %v1337_v9 }
 0x4d3   :  { %1761 = vpow2.f32 %v1649_v60 }
 0x4d4   :  { %1763 = vpow2.f32 %v1650_v54 }
 0x4d5   :  { %v1333_v11 = vpop.f32.mrf.mxu3  ;;  %v1313_v14 = vpop.f32.mrf.mxu2 }
 0x4d6   :  { %v1339_v63 = vadd.f32 %v1333_v11, %v3210_v7  ;;  %v1338_v27 = vadd.f32 %v1313_v14, %v3211_v13 }
 0x4d8   :  { %v1651_v38 = vmul.f32 -1.442695, %v1339_v63 }
 0x4d9   :  { %v1762_v1 = vpop.eup %1761 }
 0x4da   :  { %v1764_v2 = vpop.eup %1763  ;;  %v1343_v8 = vadd.f32 1.0, %v1762_v1  ;;  %1765 = vpow2.f32 %v1651_v38 }
 0x4db   :  { %v1362_v12 = vadd.f32 1.0, %v1764_v2  ;;  %v3215_v2 = vld [vmem:[#allocation63_spill] sm:$0xff] }
 0x4dc   :  { %1767 = vrcp.f32 %v1343_v8  ;;  %v1355_v40 = vand.u32 2147483648, %v1343_v8  ;;  %v1353_v29 = vand.u32 2147483647, %v1343_v8  ;;  %vm1349_vm12 = vweird.f32 %v1343_v8 }
 0x4dd   :  { %1769 = vrcp.f32 %v1362_v12  ;;  %v1374_v28 = vand.u32 2147483648, %v1362_v12  ;;  %v1372_v25 = vand.u32 2147483647, %v1362_v12  ;;  %vm1368_vm13 = vweird.f32 %v1362_v12 }
 0x4de   :  { %v1356_v17 = vor.u32 1.1754944e-38, %v1355_v40  ;;  %vm1354_vm0 = vcmp.eq.f32.partialorder %v1353_v29, 8.507059e+37 }
 0x4df   :  { %v1375_v39 = vor.u32 1.1754944e-38, %v1374_v28  ;;  %vm1373_vm1 = vcmp.eq.f32.partialorder %v1372_v25, 8.507059e+37 }
 0x4e0   :  { %v1766_v15 = vpop.eup %1765 }
 0x4e1   :  { %v1382_v16 = vadd.f32 1.0, %v1766_v15 }
 0x4e2   :  { %v1768_v34 = vpop.eup %1767 }
 0x4e3   :  { %v1770_v18 = vpop.eup %1769  ;;  %v1345_v19 = vmul.f32 %v1768_v34, %v1343_v8  ;;  %1771 = vrcp.f32 %v1382_v16  ;;  %vm1350_vm10 = vweird.f32 %v1768_v34  ;;  %v1394_v47 = vand.u32 2147483648, %v1382_v16 }
 0x4e4   :  { %v1364_v57 = vmul.f32 %v1770_v18, %v1362_v12  ;;  %1773 = vtanh.f32 %v1338_v27  ;;  %vm1369_vm11 = vweird.f32 %v1770_v18  ;;  %vm1351_vm14 = vmor %vm1349_vm12, %vm1350_vm10  ;;  %vm1388_vm3 = vweird.f32 %v1382_v16 }
 0x4e5   :  { %v1346_v35 = vsub.f32 1.0, %v1345_v19  ;;  %vm1370_vm15 = vmor %vm1368_vm13, %vm1369_vm11  ;;  %v1392_v49 = vand.u32 2147483647, %v1382_v16  ;;  %v1395_v53 = vor.u32 1.1754944e-38, %v1394_v47 }
 0x4e6   :  { %v1365_v23 = vsub.f32 1.0, %v1364_v57 }
 0x4e7   :  { %v1347_v21 = vmul.f32 %v1768_v34, %v1346_v35  ;;  %vm1393_vm5 = vcmp.eq.f32.partialorder %v1392_v49, 8.507059e+37 }
 0x4e8   :  { %v1366_v41 = vmul.f32 %v1770_v18, %v1365_v23 }
 0x4e9   :  { %v1772_v26 = vpop.eup %1771  ;;  %v1348_v24 = vadd.f32 %v1768_v34, %v1347_v21 }
 0x4ea   :  { %v1367_v30 = vadd.f32 %v1770_v18, %v1366_v41  ;;  %v1384_v36 = vmul.f32 %v1772_v26, %v1382_v16  ;;  %v1774_v22 = vpop.eup %1773  ;;  %vm1389_vm2 = vweird.f32 %v1772_v26 }
 0x4eb   :  { %v1352_v37 = vsel %vm1351_vm14, %v1768_v34, %v1348_v24  ;;  %vm1390_vm4 = vmor %vm1388_vm3, %vm1389_vm2 }
 0x4ec   :  { %v1357_v33 = vsel %vm1354_vm0, %v1356_v17, %v1352_v37  ;;  %v1371_v20 = vsel %vm1370_vm15, %v1770_v18, %v1367_v30  ;;  %v1385_v31 = vsub.f32 1.0, %v1384_v36 }
 0x4ed   :  { %v1376_v50 = vsel %vm1373_vm1, %v1375_v39, %v1371_v20  ;;  %v1399_v42 = vmul.f32 %v1774_v22, %v1357_v33 }
 0x4ee   :  { %v1398_v43 = vmul.f32 %v1376_v50, %v2898_v56  ;;  %v1386_v44 = vmul.f32 %v1772_v26, %v1385_v31 }
 0x4f0   :  { %v2906_v45 = vadd.f32 %v1399_v42, %v1398_v43  ;;  %v1387_v46 = vadd.f32 %v1772_v26, %v1386_v44 }
 0x4f2   :  { %1775 = vtanh.f32 %v2906_v45  ;;  %v1391_v51 = vsel %vm1390_vm4, %v1772_v26, %v1387_v46 }
 0x4f3   :  { %v1396_v61 = vsel %vm1393_vm5, %v1395_v53, %v1391_v51 }
 0x4f8   :  { %v1776_v3 = vpop.eup %1775 }
 0x4f9   :  { %v1402_v0 = vmul.f32 %v1776_v3, %v1396_v61 }
 0x4fb   :  { %1426 = vmatmul.f32.vlgmr.msra.gmra.mxu0 %v1402_v0  ;;  %1446 = vmatmul.f32.vlgmr.msra.gmra.mxu1 %v1402_v0 }
 0x4fc   :  { %1466 = vmatmul.f32.vlgmr.msra.gmra.mxu2 %v1402_v0  ;;  %1486 = vmatmul.f32.vlgmr.msra.gmra.mxu3 %v1402_v0 }
 0x578   :  { %v1427_v56 = vpop.f32.mrf.mxu0  ;;  %v1447_v10 = vpop.f32.mrf.mxu1 }
 0x579   :  { %v1490_v48 = vadd.f32 %v1427_v56, %v3212_v52  ;;  %v1491_v6 = vadd.f32 %v1447_v10, %v3213_v58 }
 0x57b   :  { %v1652_v4 = vmul.f32 -1.442695, %v1490_v48  ;;  %v1653_v32 = vmul.f32 -1.442695, %v1491_v6 }
 0x57d   :  { %1777 = vpow2.f32 %v1652_v4 }
 0x57e   :  { %1779 = vpow2.f32 %v1653_v32 }
 0x57f   :  { %v1487_v62 = vpop.f32.mrf.mxu3  ;;  %v1467_v7 = vpop.f32.mrf.mxu2 }
 0x580   :  { %v1493_v55 = vadd.f32 %v1487_v62, %v3214_v59  ;;  %v1492_v8 = vadd.f32 %v1467_v7, %v3215_v2 }
 0x582   :  { %v1654_v5 = vmul.f32 -1.442695, %v1493_v55 }
 0x583   :  { %v1778_v9 = vpop.eup %1777 }
 0x584   :  { %v1780_v60 = vpop.eup %1779  ;;  %v1497_v54 = vadd.f32 1.0, %v1778_v9  ;;  %1781 = vpow2.f32 %v1654_v5 }
 0x585   :  { %v1516_v11 = vadd.f32 1.0, %v1780_v60 }
 0x586   :  { %1783 = vrcp.f32 %v1497_v54  ;;  %v1509_v13 = vand.u32 2147483648, %v1497_v54  ;;  %v1507_v19 = vand.u32 2147483647, %v1497_v54  ;;  %vm1503_vm8 = vweird.f32 %v1497_v54 }
 0x587   :  { %1785 = vrcp.f32 %v1516_v11  ;;  %v1528_v27 = vand.u32 2147483648, %v1516_v11  ;;  %v1526_v35 = vand.u32 2147483647, %v1516_v11  ;;  %vm1522_vm9 = vweird.f32 %v1516_v11 }
 0x588   :  { %v1510_v28 = vor.u32 1.1754944e-38, %v1509_v13  ;;  %vm1508_vm12 = vcmp.eq.f32.partialorder %v1507_v19, 8.507059e+37 }
 0x589   :  { %v1529_v41 = vor.u32 1.1754944e-38, %v1528_v27  ;;  %vm1527_vm13 = vcmp.eq.f32.partialorder %v1526_v35, 8.507059e+37 }
 0x58a   :  { %v1782_v63 = vpop.eup %1781 }
 0x58b   :  { %v1536_v38 = vadd.f32 1.0, %v1782_v63 }
 0x58c   :  { %v1784_v1 = vpop.eup %1783 }
 0x58d   :  { %v1786_v12 = vpop.eup %1785  ;;  %v1499_v14 = vmul.f32 %v1784_v1, %v1497_v54  ;;  %1787 = vrcp.f32 %v1536_v38  ;;  %vm1504_vm6 = vweird.f32 %v1784_v1  ;;  %v1548_v31 = vand.u32 2147483648, %v1536_v38 }
 0x58e   :  { %v1518_v15 = vmul.f32 %v1786_v12, %v1516_v11  ;;  %1789 = vtanh.f32 %v1492_v8  ;;  %vm1523_vm7 = vweird.f32 %v1786_v12  ;;  %vm1505_vm10 = vmor %vm1503_vm8, %vm1504_vm6  ;;  %vm1542_vm15 = vweird.f32 %v1536_v38 }
 0x58f   :  { %v1500_v16 = vsub.f32 1.0, %v1499_v14  ;;  %vm1524_vm11 = vmor %vm1522_vm9, %vm1523_vm7  ;;  %v1546_v50 = vand.u32 2147483647, %v1536_v38  ;;  %v1549_v43 = vor.u32 1.1754944e-38, %v1548_v31 }
 0x590   :  { %v1519_v34 = vsub.f32 1.0, %v1518_v15 }
 0x591   :  { %v1501_v18 = vmul.f32 %v1784_v1, %v1500_v16  ;;  %vm1547_vm1 = vcmp.eq.f32.partialorder %v1546_v50, 8.507059e+37 }
 0x592   :  { %v1520_v57 = vmul.f32 %v1786_v12, %v1519_v34 }
 0x593   :  { %v1788_v23 = vpop.eup %1787  ;;  %v1502_v40 = vadd.f32 %v1784_v1, %v1501_v18 }
 0x594   :  { %v1521_v21 = vadd.f32 %v1786_v12, %v1520_v57  ;;  %v1538_v29 = vmul.f32 %v1788_v23, %v1536_v38  ;;  %v1790_v26 = vpop.eup %1789  ;;  %vm1543_vm14 = vweird.f32 %v1788_v23 }
 0x595   :  { %v1506_v25 = vsel %vm1505_vm10, %v1784_v1, %v1502_v40  ;;  %vm1544_vm0 = vmor %vm1542_vm15, %vm1543_vm14 }
 0x596   :  { %v1511_v24 = vsel %vm1508_vm12, %v1510_v28, %v1506_v25  ;;  %v1525_v17 = vsel %vm1524_vm11, %v1786_v12, %v1521_v21  ;;  %v1539_v30 = vsub.f32 1.0, %v1538_v29 }
 0x597   :  { %v1530_v36 = vsel %vm1527_vm13, %v1529_v41, %v1525_v17  ;;  %v1553_v39 = vmul.f32 %v1790_v26, %v1511_v24 }
 0x598   :  { %v1552_v37 = vmul.f32 %v1530_v36, %v2906_v45  ;;  %v1540_v22 = vmul.f32 %v1788_v23, %v1539_v30 }
 0x59a   :  { %v1554_v33 = vadd.f32 %v1553_v39, %v1552_v37  ;;  %v1541_v20 = vadd.f32 %v1788_v23, %v1540_v22 }
 0x59c   :  { %1791 = vtanh.f32 %v1554_v33  ;;  %1558 = vst [vmem:[#allocation7] sm:$0xff] %v1554_v33  ;;  %v1545_v42 = vsel %vm1544_vm0, %v1788_v23, %v1541_v20 }
 0x59d   :  { %1580 = dma.vmem_to_hbm [thread:$0]  %s1576_s9, 128, %s1578_s12, [#allocation8]   ;;  %v1550_v45 = vsel %vm1547_vm1, %v1549_v43, %v1545_v42 }
 0x5a2   :  { %v1792_v44 = vpop.eup %1791 }
 0x5a3   :  { %v1556_v46 = vmul.f32 %v1792_v44, %v1550_v45 }
 0x5a5   :  { %1557 = vst [vmem:[#allocation6] sm:$0xff] %v1556_v46 }
 0x5a6   :  { %1569 = dma.vmem_to_hbm [thread:$0]  %s1565_s14, 128, %s1567_s16, [#allocation5]  }
 0x5a7   :  { %1931 = dma.done.wait [#allocation5], 128  }
 0x5a8   :  { %1932 = vsyncadd [#allocation5], 4294967168 }
 0x5a9   :  { %1933 = dma.done.wait [#allocation8], 128  }
 0x5aa   :  { %1934 = vsyncadd [#allocation8], 4294967168 }
 0x5ab   :  { %1589 = vsyncpa [#allocation4], 1 }
 0x5ac   :  { %1590 = vsyncpa [#allocation5], 1 }
 0x5ad   :  { %1591 = vsyncpa [#allocation8], 1 }

</bundles_post_ra>
